<compile_context>
chip_gen: v6e
topology: v6e:2x2x1
jax: 0.10.0
libtpu: 0.0.40
codegen_flags: <defaults>
</compile_context>

<pallas_src>
import functools

import jax
import jax.numpy as jnp
from jax.experimental import pallas as pl
from jax.experimental.pallas import tpu as pltpu


def _cheby_conv_kernel(coef_ref, lap_ref, x_ref, y_ref, *, k, mxu_dtype):
    """coef_ref: SMEM (k+1,) f32 (scale pre-folded);
    lap_ref: VMEM (N_pad, N_pad) mxu_dtype (resident across the F grid);
    x_ref / y_ref: VMEM (N_pad, TF) feature tiles."""
    lap = lap_ref[...]                    # mxu_dtype operand for every dot
    x = x_ref[...]                        # mxu_dtype
    x_f32 = x.astype(jnp.float32)

    # i == 0 term: P_0 = x   (2/(k+1) and c0/2 already folded into coef)
    acc = coef_ref[0] * x_f32
    p_prev_prev = x_f32                   # recursion state kept in f32

    if k >= 1:
        # i == 1 term: P_1 = L @ x   (bf16 operands, f32 accumulate)
        p_prev = jnp.dot(lap, x, preferred_element_type=jnp.float32)
        acc = acc + coef_ref[1] * p_prev

        # i >= 2 terms: P_i = 2 * L @ P_{i-1} - P_{i-2}  (static k -> unrolled)
        for i in range(2, k + 1):
            p = (2.0 * jnp.dot(lap, p_prev.astype(mxu_dtype),
                               preferred_element_type=jnp.float32)
                 - p_prev_prev)
            acc = acc + coef_ref[i] * p
            p_prev_prev, p_prev = p_prev, p

    y_ref[...] = acc.astype(y_ref.dtype)


def _round_up(v, m):
    return ((v + m - 1) // m) * m


def _pick_feature_tile(f_pad):
    """Lane-dense feature tile; prefer >=2 grid steps so DMA/compute overlap."""
    for tf in (512, 256, 128):
        if f_pad % tf == 0 and f_pad // tf >= 2:
            return tf
    return f_pad


def cheby_conv2_forward(filter_param, chebynodes_vals, scaled_laplacian, x, *,
                        k, mxu_dtype=jnp.bfloat16):
    """Pallas implementation of ChebyConv2.forward (2-D laplacian case)."""
    # ---- coefficient glue (tiny, plain JAX) ----
    fp = jax.nn.relu(filter_param)                       # (k+1, 1)
    fp = chebynodes_vals @ fp                            # (k+1, 1)
    fp = fp.at[0].set(fp[0] / 2.0)
    coef = (fp[:, 0] * (2.0 / (k + 1))).astype(jnp.float32)   # fold final scale

    # TODO(synk): 1-D (diagonal / eigenvalue) multiplicator branch of
    # get_cheby_poly (elementwise recursion) is not implemented; matrix case only.
    assert scaled_laplacian.ndim == 2

    N, F = x.shape
    out_dtype = x.dtype

    # Pad N and F to multiples of 128: fills the MXU contraction dim and keeps
    # the output tile lane-dense (unmasked vst).  Zero padding is exact: padded
    # rows/cols of L and x stay zero through the whole recursion.
    n_pad = _round_up(N, 128)
    f_pad = _round_up(F, 128)
    tf = _pick_feature_tile(f_pad)

    lap_p = jnp.zeros((n_pad, n_pad), mxu_dtype).at[:N, :N].set(
        scaled_laplacian.astype(mxu_dtype))
    x_p = jnp.zeros((n_pad, f_pad), mxu_dtype).at[:N, :F].set(
        x.astype(mxu_dtype))

    # ---- VMEM budget / cost estimate ----
    op_itemsize = jnp.dtype(mxu_dtype).itemsize
    out_itemsize = jnp.dtype(out_dtype).itemsize
    lap_bytes = n_pad * n_pad * op_itemsize
    in_tile_bytes = n_pad * tf * op_itemsize
    out_tile_bytes = n_pad * tf * out_itemsize
    live_f32_bytes = 4 * n_pad * tf * 4          # acc, p, p_prev, p_prev_prev
    vmem_need = 2 * lap_bytes + 2 * (in_tile_bytes + out_tile_bytes) + live_f32_bytes
    # Cap at 64 MiB so the same plan fits v7x (64 MiB physical) as well as v5e/v6e.
    vmem_limit = min(64 * 1024 * 1024,
                     max(32 * 1024 * 1024, int(vmem_need * 1.25)))
    # TODO(synk): graphs where the laplacian no longer fits VMEM need a
    # row/K-tiled matmul per Chebyshev step (accumulator-in-scratch pattern).

    flops = 2 * k * n_pad * n_pad * f_pad + 2 * (k + 1) * n_pad * f_pad
    bytes_accessed = (lap_bytes + n_pad * f_pad * op_itemsize
                      + n_pad * f_pad * out_itemsize)

    kernel = functools.partial(_cheby_conv_kernel, k=k, mxu_dtype=mxu_dtype)

    y_pad = pl.pallas_call(
        kernel,
        out_shape=jax.ShapeDtypeStruct((n_pad, f_pad), out_dtype),
        grid_spec=pltpu.PrefetchScalarGridSpec(
            num_scalar_prefetch=1,                       # coef -> SMEM
            grid=(f_pad // tf,),
            in_specs=[
                # Laplacian: full-resident block, same block index every step
                # -> DMA'd once and revisited.
                pl.BlockSpec((n_pad, n_pad), lambda f, coef: (0, 0)),
                # x: lane-dense (N_pad, TF) feature tile.
                pl.BlockSpec((n_pad, tf), lambda f, coef: (0, f)),
            ],
            out_specs=pl.BlockSpec((n_pad, tf), lambda f, coef: (0, f)),
        ),
        compiler_params=pltpu.CompilerParams(
            dimension_semantics=("parallel",),           # megacore on v7x
            vmem_limit_bytes=vmem_limit,
        ),
        cost_estimate=pl.CostEstimate(
            flops=flops, transcendentals=0, bytes_accessed=bytes_accessed),
    )(coef, lap_p, x_p)

    return y_pad[:N, :F]


def cheby_conv2_reference(filter_param, chebynodes_vals, scaled_laplacian, x, *,
                          k, mxu_dtype=jnp.float32):
    """Pure-JAX reference.  mxu_dtype=f32 mirrors the PyTorch forward exactly;
    mxu_dtype=bf16 mirrors the kernel's mixed-precision matmuls."""
    fp = jax.nn.relu(filter_param)
    fp = chebynodes_vals @ fp
    fp = fp.at[0].set(fp[0] / 2.0)
    coef = (fp[:, 0] * (2.0 / (k + 1))).astype(jnp.float32)

    lap_m = scaled_laplacian.astype(mxu_dtype)
    x_m = x.astype(mxu_dtype)

    polys = [x_m.astype(jnp.float32)]
    if k >= 1:
        polys.append(jnp.dot(lap_m, x_m, preferred_element_type=jnp.float32))
    for i in range(2, k + 1):
        polys.append(2.0 * jnp.dot(lap_m, polys[i - 1].astype(mxu_dtype),
                                   preferred_element_type=jnp.float32)
                     - polys[i - 2])

    y = coef[0] * polys[0]
    for i in range(1, k + 1):
        y = y + coef[i] * polys[i]
    return y.astype(x.dtype)


if __name__ == "__main__":
    k = 3          # Chebyshev order -> k+1 = 4 polynomial terms
    N = 96         # graph nodes (exercises padding to 128)
    F = 512        # feature channels (2 lane-dense tiles of 256)

    key = jax.random.PRNGKey(0)
    k_fp, k_cn, k_lap, k_x = jax.random.split(key, 4)

    # xavier_normal_ on (k+1, 1) -> std = sqrt(2/(1+1)) = 1
    filter_param = jax.random.normal(k_fp, (k + 1, 1), dtype=jnp.float32)
    chebynodes_vals = jax.random.normal(k_cn, (k + 1, k + 1), dtype=jnp.float32)

    # Symmetric, spectrally ~[-1, 1] "scaled laplacian" so the recursion stays bounded.
    A = jax.random.normal(k_lap, (N, N), dtype=jnp.float32)
    scaled_laplacian = (A + A.T) / (2.0 * jnp.sqrt(jnp.float32(N)))

    x = jax.random.normal(k_x, (N, F), dtype=jnp.float32)

    ref_f32 = cheby_conv2_reference(filter_param, chebynodes_vals,
                                    scaled_laplacian, x, k=k,
                                    mxu_dtype=jnp.float32)

    # --- f32-operand path: tight check against the exact f32 reference ---
    y_f32 = jax.block_until_ready(
        cheby_conv2_forward(filter_param, chebynodes_vals, scaled_laplacian, x,
                            k=k, mxu_dtype=jnp.float32))
    assert y_f32.shape == (N, F)
    assert jnp.allclose(y_f32, ref_f32, atol=2e-4, rtol=2e-4), "f32 path mismatch"

    # --- default bf16-operand / f32-accumulate path (MXU-native, faster) ---
    y_bf16 = jax.block_until_ready(
        cheby_conv2_forward(filter_param, chebynodes_vals, scaled_laplacian, x,
                            k=k, mxu_dtype=jnp.bfloat16))
    assert y_bf16.shape == (N, F)
    ref_bf16 = cheby_conv2_reference(filter_param, chebynodes_vals,
                                     scaled_laplacian, x, k=k,
                                     mxu_dtype=jnp.bfloat16)
    assert jnp.allclose(y_bf16, ref_bf16, atol=2e-3, rtol=2e-3), \
        "bf16 path mismatch vs precision-mirrored reference"
    rel_err = jnp.linalg.norm(y_bf16 - ref_f32) / jnp.linalg.norm(ref_f32)
    assert rel_err < 2e-2, f"bf16 path drifted too far from f32 reference: {rel_err}"

    print("KERNEL_OK")
</pallas_src>

<mosaic_0001>
module attributes {stable_mosaic.version = 11 : i64} {
  func.func @_cheby_conv_kernel(%arg0: i32, %arg1: memref<4xf32, #tpu.memory_space<smem>>, %arg2: memref<128x128xf32, #tpu.memory_space<vmem>>, %arg3: memref<128x256xf32, #tpu.memory_space<vmem>>, %arg4: memref<128x256xf32, #tpu.memory_space<vmem>>) attributes {dimension_semantics = [#tpu.dimension_semantics<parallel>], iteration_bounds = array<i64: 2>, scalar_prefetch = 1 : i64, scratch_operands = 0 : i64, tpu.core_type = #tpu.core_type<tc>, window_params = [{pipeline_mode = #tpu.pipeline_mode<synchronous>, transform_indices = @transform_0, window_bounds = array<i64: 128, 128>}, {transform_indices = @transform_1, window_bounds = array<i64: 128, 256>}, {transform_indices = @transform_2, window_bounds = array<i64: 128, 256>}]} {
    %c0 = arith.constant 0 : index
    %c0_0 = arith.constant 0 : index
    %0 = vector.load %arg2[%c0, %c0_0] : memref<128x128xf32, #tpu.memory_space<vmem>>, vector<128x128xf32>
    %c0_1 = arith.constant 0 : index
    %c0_2 = arith.constant 0 : index
    %1 = vector.load %arg3[%c0_1, %c0_2] : memref<128x256xf32, #tpu.memory_space<vmem>>, vector<128x256xf32>
    %c0_3 = arith.constant 0 : index
    %2 = memref.load %arg1[%c0_3] : memref<4xf32, #tpu.memory_space<smem>>
    %3 = vector.broadcast %2 : f32 to vector<128x256xf32>
    %4 = arith.mulf %3, %1 : vector<128x256xf32>
    %cst = arith.constant dense<0.000000e+00> : vector<128x256xf32>
    %5 = tpu.matmul %0, %1, %cst {dimension_numbers = #tpu.dot_dimension_numbers<[1], [0], [0], [1], [0, 0, 1, 1], [], []>} : vector<128x128xf32>, vector<128x256xf32>, vector<128x256xf32> -> vector<128x256xf32>
    %c1 = arith.constant 1 : index
    %6 = memref.load %arg1[%c1] : memref<4xf32, #tpu.memory_space<smem>>
    %7 = vector.broadcast %6 : f32 to vector<128x256xf32>
    %8 = arith.mulf %7, %5 : vector<128x256xf32>
    %9 = arith.addf %4, %8 : vector<128x256xf32>
    %cst_4 = arith.constant dense<0.000000e+00> : vector<128x256xf32>
    %10 = tpu.matmul %0, %5, %cst_4 {dimension_numbers = #tpu.dot_dimension_numbers<[1], [0], [0], [1], [0, 0, 1, 1], [], []>} : vector<128x128xf32>, vector<128x256xf32>, vector<128x256xf32> -> vector<128x256xf32>
    %cst_5 = arith.constant 2.000000e+00 : f32
    %11 = vector.broadcast %cst_5 : f32 to vector<128x256xf32>
    %12 = arith.mulf %11, %10 : vector<128x256xf32>
    %13 = arith.subf %12, %1 : vector<128x256xf32>
    %c2 = arith.constant 2 : index
    %14 = memref.load %arg1[%c2] : memref<4xf32, #tpu.memory_space<smem>>
    %15 = vector.broadcast %14 : f32 to vector<128x256xf32>
    %16 = arith.mulf %15, %13 : vector<128x256xf32>
    %17 = arith.addf %9, %16 : vector<128x256xf32>
    %cst_6 = arith.constant dense<0.000000e+00> : vector<128x256xf32>
    %18 = tpu.matmul %0, %13, %cst_6 {dimension_numbers = #tpu.dot_dimension_numbers<[1], [0], [0], [1], [0, 0, 1, 1], [], []>} : vector<128x128xf32>, vector<128x256xf32>, vector<128x256xf32> -> vector<128x256xf32>
    %cst_7 = arith.constant 2.000000e+00 : f32
    %19 = vector.broadcast %cst_7 : f32 to vector<128x256xf32>
    %20 = arith.mulf %19, %18 : vector<128x256xf32>
    %21 = arith.subf %20, %5 : vector<128x256xf32>
    %c3 = arith.constant 3 : index
    %22 = memref.load %arg1[%c3] : memref<4xf32, #tpu.memory_space<smem>>
    %23 = vector.broadcast %22 : f32 to vector<128x256xf32>
    %24 = arith.mulf %23, %21 : vector<128x256xf32>
    %25 = arith.addf %17, %24 : vector<128x256xf32>
    %c0_8 = arith.constant 0 : index
    %c0_9 = arith.constant 0 : index
    %26 = vector.load %arg4[%c0_8, %c0_9] : memref<128x256xf32, #tpu.memory_space<vmem>>, vector<128x256xf32>
    tpu.vector_store %arg4[%c0_8, %c0_9], %25 {strides = array<i32>} : memref<128x256xf32, #tpu.memory_space<vmem>>, vector<128x256xf32>,
    return
  }
  func.func @transform_0(%arg0: i32, %arg1: memref<4xf32, #tpu.memory_space<smem>>) -> (i32, i32) {
    %c0_i32 = arith.constant 0 : i32
    %c0_i32_0 = arith.constant 0 : i32
    %c0_i32_1 = arith.constant 0 : i32
    return %c0_i32, %c0_i32_0 : i32, i32
  }
  func.func @transform_1(%arg0: i32, %arg1: memref<4xf32, #tpu.memory_space<smem>>) -> (i32, i32) {
    %c0_i32 = arith.constant 0 : i32
    %c0_i32_0 = arith.constant 0 : i32
    return %c0_i32, %arg0 : i32, i32
  }
  func.func @transform_2(%arg0: i32, %arg1: memref<4xf32, #tpu.memory_space<smem>>) -> (i32, i32) {
    %c0_i32 = arith.constant 0 : i32
    %c0_i32_0 = arith.constant 0 : i32
    return %c0_i32, %arg0 : i32, i32
  }
}

</mosaic_0001>

<bundles_post_ra>
// kernel: tpu_custom_call.1
= control target key start
LH: loop header
LB: loop body
LE: loop exit
PB: predicated region body
PF: predicated region fallthrough
CT: control target
= control target key end

     0   :  { %s1460_s12 = smov [#allocation3]   ;;  %s2585_s0 = inlined_call_operand.hbm [shape: f32[4], index: 0, kind: input, shape index: {}]   ;;  %s2586_s1 = inlined_call_operand.hbm [shape: f32[128,128], index: 1, kind: input, shape index: {}]   ;;  %s2587_s2 = inlined_call_operand.hbm [shape: f32[128,512], index: 2, kind: input, shape index: {}]   ;;  %s2588_s3 = inlined_call_operand.hbm [shape: f32[128,512], index: 3, kind: output, shape index: {}]  }
   0x1   :  { %9 = dma.hbm_to_smem %s2585_s0, 16, %s1460_s12, [#allocation2] }
   0x2   :  { %1430 = dma.done.wait [#allocation2], 16 }
   0x3   :  { %1431 = vsyncadd [#allocation2], 4294967280 }
   0x4   :  { %11 = sfence }
   0x5   :  { %12 = vsyncpa [#allocation5], 0 }
   0x6   :  { %13 = vsyncpa [#allocation8], 0 }
   0x7   :  { %15 = vsyncpa [#allocation8 + $0x1], 0 }
   0x8   :  { %16 = vsyncpa [#allocation6], 0 }
   0x9   :  { %18 = vsyncpa [#allocation6 + $0x1], 0  ;;  %s1496_s15 = smov 0   ;;  %s1498_s16 = smov 0  }
   0xa   :  { %s1500_s17 = smov 0   ;;  %s1502_s18 = smov 0  }
   0xb LB: > { %s1517_s0 = sadd.s32 4294967295, %s1458_s18   ;;  %s1206_s19 = sadd.s32 4294967294, %s1458_s18   ;;  %s1458_s18 = sphi %s1502_s18, %s2899_s18   ;;  %s1454_s17 = sphi %s1500_s17, %s2898_s17   ;;  %s1450_s16 = sphi %s1498_s16, %s2897_s16   ;;  %s1446_s15 = sphi %s1496_s15, %s2896_s15  }
   0xc   : > { %s1521_s20 = sadd.s32 1, %s1458_s18   ;;  %s52_s21 = sadd.s32 1, %s1454_s17 }
   0xd   : > { %s49_s22 = ssub.s32 %s1458_s18, %s1521_s20  ;;  %p59_p0 = scmp.ne.s32.totalorder %s1454_s17, %s1450_s16 }
   0xe   : > { %p50_p1 = scmp.eq.s32.totalorder %s49_s22, 0  ;;  %p60_p2 = scmp.eq.s32.totalorder %s1458_s18, 0 }
   0xf   : > { %p65_p3 = scmp.ne.s32.totalorder %s1450_s16, %s1446_s15  ;;  %p2592_p4 = scmp.eq.s32.totalorder %s1517_s0, 0 }
  0x10   : > { %s1533_s23 = scalar_select %p50_p1, %s1454_s17, %s52_s21  }
  0x11   : > { %p1535_p5 = por %p60_p2, %p59_p0  ;;  %p1541_p6 = por %p2592_p4, %p65_p3 }
  0x12   : > { %p89_p7 = scmp.eq.s32.totalorder %s1517_s0, 1  ;;  %p95_p8 = scmp.eq.s32.totalorder %s1206_s19, 1 }
  0x13   : > { %s2714_s25 = scalar_select %p1541_p6, 1, 0 }
  0x14   : > { %p1207_p9 = scmp.ge.s32.totalorder %s1458_s18, 1  ;;  %p102_p10 = scmp.lt.s32.totalorder %s1458_s18, 3 }
  0x15   : > { %p1548_p11 = por %p89_p7, %p59_p0  ;;  %p1552_p12 = por %p95_p8, %p65_p3 }
  0x16   : > { %p1556_p13 = pnand %p1207_p9, %p102_p10  ;;  %s1461_s29 = smov [#allocation4]  }
  0x17   : > { %s2715_s26 = scalar_select %p1548_p11, 1, 0 }
  0x18   : > { %s2716_s27 = scalar_select %p1552_p12, 1, 0 }
  0x19   : > { %s2717_s28 = scalar_select %p1556_p13, 1, 0 }
  0x1a   : > { %p1267_p1 = pneg %p1556_p13  ;;  %s114_s30 = sshll.u32 %s1461_s29, 4  ;;  %s115_s30 = int_to_ptr.vmem [resolvable:$true] %s114_s30 }
  0x1b   : > { %p1280_p3 = scmp.lt.s32.totalorder %s1458_s18, 2  ;;  %s128_s5 = sand.u32 1, %s1454_s17  }
  0x1c   : > { %p1564_p2 = pnand %p1267_p1, %p2592_p4  ;;  %s1345_s6 = scalar_lea.vmem %s115_s30, 2048 }
  0x1d   : > { %p1346_p8 = scmp.ne.s32.totalorder %s115_s30, %s1345_s6  ;;  %p1353_p12 = scmp.lt.s32.totalorder %s115_s30, %s115_s30 }
  0x1e   : > { %p1336_p7 = pneg %p1564_p2  ;;  %p1354_p11 = scmp.lt.s32.totalorder %s1345_s6, %s1345_s6 }
  0x20   : > { %p1348_p9 = pnand %p1346_p8, %p1336_p7  ;;  %p1355_p6 = por %p1354_p11, %p1353_p12 }
  0x22   : > { %p1349_p10 = pneg %p1348_p9 }
  0x24   : > { %p1356_p13 = pnand %p1355_p6, %p1349_p10 }
  0x26   : > { %1359 = shalt.err (!%p1356_p13)
}
  0x27   : > { %s1462_s7 = smov 128   ;;  %s1463_s8 = smov 8  }
  0x28   : > { %1270 = dma.hbm_to_vmem [thread:$0]  (!%p1564_p2), %s2586_s1, 2048, %s115_s30, [#allocation5], %s1462_s7, %s1462_s7, %s1463_s8  }
  0x29   : > { %p1582_p1 = pnand %p1280_p3, %p1535_p5  ;;  %s1210_s12 = sshll.u32 %s128_s5, 8 }
  0x2a   : > { %s1225_s13 = sshll.u32 %s1458_s18, 8  ;;  %s132_s22 = scalar_lea.vmem [#allocation7], %s1210_s12 }
  0x2b   : > { %s1590_s21 = scalar_lea.hbm %s2587_s2, %s1225_s13  ;;  %s139_s29 = sshll.u32 %s132_s22, 4  ;;  %s1592_s29 = int_to_ptr.vmem [resolvable:$true] %s139_s29 }
  0x2c   : > { %s1594_s24 = scalar_lea.sflag [#allocation8], %s128_s5  ;;  %s1360_s30 = scalar_lea.hbm %s1590_s21, 4096 }
  0x2d   : > { %p1361_p5 = scmp.ne.s32.totalorder %s1590_s21, %s1360_s30  ;;  %p1362_p6 = pneg %p1582_p1 }
  0x2e   : > { %s1365_s7 = scalar_lea.hbm %s2587_s2, 8192  ;;  %p1366_p13 = scmp.lt.s32.totalorder %s1590_s21, %s2587_s2 }
  0x2f   : > { %p1363_p11 = pnand %p1362_p6, %p1361_p5  ;;  %p1367_p2 = scmp.lt.s32.totalorder %s1365_s7, %s1360_s30 }
  0x31   : > { %p1364_p12 = pneg %p1363_p11  ;;  %p1368_p3 = por %p1367_p2, %p1366_p13 }
  0x33   : > { %p1369_p7 = pnand %p1368_p3, %p1364_p12 }
  0x35   : > { %1372 = shalt.err (!%p1369_p7)
}
  0x36   : > { %s1373_s5 = scalar_lea.vmem %s1592_s29, 4096  ;;  %s1464_s10 = smov [#allocation7]  }
  0x37   : > { %p1374_p8 = scmp.ne.s32.totalorder %s1592_s29, %s1373_s5  ;;  %s1378_s12 = sshll.u32 %s1464_s10, 4  ;;  %s1379_s12 = int_to_ptr.vmem [resolvable:$false] %s1378_s12 }
  0x38   : > { %s1380_s13 = scalar_lea.vmem %s1379_s12, 8192  ;;  %p1381_p5 = scmp.lt.s32.totalorder %s1592_s29, %s1379_s12 }
  0x39   : > { %p1376_p9 = pnand %p1374_p8, %p1362_p6  ;;  %p1382_p11 = scmp.lt.s32.totalorder %s1380_s13, %s1373_s5 }
  0x3b   : > { %p1377_p10 = pneg %p1376_p9  ;;  %p1383_p0 = por %p1382_p11, %p1381_p5 }
  0x3d   : > { %p1384_p4 = pnand %p1383_p0, %p1377_p10 }
  0x3f   : > { %1387 = shalt.err (!%p1384_p4)
}
  0x40   : > { %s1465_s14 = smov 512   ;;  %s1466_s19 = smov 256  }
  0x41   : > { %s1467_s22 = smov 16   ;;  %p2720_p6 = scmp.ne.s32.totalorder %s2717_s28, 0 }
  0x42   : > { %1274 = dma.hbm_to_vmem [thread:$0]  (!%p1582_p1), %s1590_s21, 4096, %s1592_s29, %s1594_s24, %s1465_s14, %s1466_s19, %s1467_s22  }
  0x43   : > { %151 = sbr.rel (%p2720_p6) target bundleno = 937 (0x3a9), region = 28 }
  0x48   : > { %p2721_p12 = scmp.eq.s32.totalorder %s1517_s0, 0 }
  0x4a   : > { %1433 = dma.done.wait (%p2721_p12), [#allocation5], 2048   ;;  %p2722_p13 = pmov %p2721_p12 }
  0x4b   : > { %s1622_s30 = sand.u32 1, %s1450_s16   ;;  %p2723_p4 = scmp.ne.s32.totalorder %s2714_s25, 0 }
  0x4c   : > { %1435 = vsyncadd (%p2722_p13), [#allocation5], 4294965248  ;;  %s1215_s4 = sshll.u32 %s1622_s30, 8  ;;  %s158_s6 = scalar_lea.sflag [#allocation8], %s1622_s30 }
  0x4d   : > { %s1628_s11 = scalar_lea.vmem [#allocation7], %s1215_s4 }
  0x4e   : > { %1437 = dma.done.wait (%p2723_p4), %s158_s6, 4096  }
  0x4f   : > { %1439 = vsyncadd (%p2723_p4), %s158_s6, 4294963200  ;;  %v2593_v0 = vmov 0.0   ;;  %v1637_v1 = vld [vmem:[%s1628_s11 + $0xf8] sm:$0xff]  ;;  %v1640_v2 = vld [vmem:[%s1628_s11 + $0xf0] sm:$0xff]  ;;  %s232_s25 = sld [smem:[#allocation3]]  ;;  %s2309_s24 = scalar_lea.vmem [#allocation9], %s1215_s4 }
  0x50   : > { %378 = vmatprep.mubr.f32.mxu1 %v2593_v0  ;;  %330 = vmatprep.mubr.f32.mxu0 %v2593_v0  ;;  %v1643_v3 = vld [vmem:[%s1628_s11 + $0xe8] sm:$0xff]  ;;  %v1647_v4 = vld [vmem:[%s1628_s11 + $0xe0] sm:$0xff]  ;;  %v1652_v5 = vld [vmem:[%s1628_s11 + $0xd8] sm:$0xff]  ;;  %s1217_s28 = sld [smem:[#allocation3 + $0x1]]  ;;  %s1226_s7 = sshll.u32 %s1517_s0, 8 }
  0x51   : > { %1227 = vmatprep.subr.mxu1 %v1637_v1  ;;  %266 = vmatprep.subr.mxu0 %v1637_v1  ;;  %v1657_v6 = vld [vmem:[%s1628_s11 + $0xd0] sm:$0xff]  ;;  %v1662_v7 = vld [vmem:[%s1628_s11 + $0xc8] sm:$0xff]  ;;  %v1667_v8 = vld [vmem:[%s1628_s11 + $0xc0] sm:$0xff]  ;;  %s1218_s21 = sld [smem:[#allocation3 + $0x2]]  ;;  %s1121_s8 = sshll.u32 %s2309_s24, 4  ;;  %s2540_s8 = int_to_ptr.vmem [resolvable:$true] %s1121_s8 }
  0x52   : > { %1243 = vmatpush1.msra.mxu1 %v1640_v2  ;;  %267 = vmatpush1.msra.mxu0 %v1640_v2  ;;  %v1672_v9 = vld [vmem:[%s1628_s11 + $0xb8] sm:$0xff]  ;;  %v1677_v10 = vld [vmem:[%s1628_s11 + $0xb0] sm:$0xff]  ;;  %v1682_v11 = vld [vmem:[%s1628_s11 + $0xa8] sm:$0xff]  ;;  %s2205_s29 = sld [smem:[#allocation3 + $0x3]]  ;;  %s2538_s10 = scalar_lea.hbm %s2588_s3, %s1226_s7 }
  0x53   : > { %1228 = vmatprep.subr.mxu1 %v1643_v3  ;;  %268 = vmatprep.subr.mxu0 %v1643_v3  ;;  %v1687_v12 = vld [vmem:[%s1628_s11 + $0xa0] sm:$0xff]  ;;  %v1692_v13 = vld [vmem:[%s1628_s11 + $0x98] sm:$0xff]  ;;  %v1697_v14 = vld [vmem:[%s1628_s11 + $0x90] sm:$0xff]  ;;  %s1108_s0 = scalar_lea.sflag [#allocation6], %s1622_s30  ;;  %s1388_s12 = scalar_lea.vmem %s2540_s8, 4096 }
  0x54   : > { %1244 = vmatpush1.msra.mxu1 %v1647_v4  ;;  %269 = vmatpush1.msra.mxu0 %v1647_v4  ;;  %v1702_v15 = vld [vmem:[%s1628_s11 + $0x88] sm:$0xff]  ;;  %v1707_v16 = vld [vmem:[%s1628_s11 + $0x80] sm:$0xff]  ;;  %v1712_v17 = vld [vmem:[%s1628_s11 + $0x78] sm:$0xff]  ;;  %p1389_p0 = scmp.ne.s32.totalorder %s2540_s8, %s1388_s12  ;;  %p2893_p1 = scmp.ne.s32.totalorder %s2715_s26, 0 }
  0x55   : > { %1229 = vmatprep.subr.mxu1 %v1652_v5  ;;  %270 = vmatprep.subr.mxu0 %v1652_v5  ;;  %v1717_v18 = vld [vmem:[%s1628_s11 + $0x70] sm:$0xff]  ;;  %v1722_v19 = vld [vmem:[%s1628_s11 + $0x68] sm:$0xff]  ;;  %v1727_v20 = vld [vmem:[%s1628_s11 + $0x60] sm:$0xff]  ;;  %s1469_s13 = smov [#allocation9]  }
  0x56   : > { %1245 = vmatpush1.msra.mxu1 %v1657_v6  ;;  %271 = vmatpush1.msra.mxu0 %v1657_v6  ;;  %2724 = vst [vmem:[#allocation14_spill] sm:$0xff] %v1722_v19  ;;  %2725 = vst [vmem:[#allocation15_spill] sm:$0xff] %v1727_v20  ;;  %v1732_v21 = vld [vmem:[%s1628_s11 + $0x58] sm:$0xff]  ;;  %v1737_v22 = vld [vmem:[%s1628_s11 + $0x50] sm:$0xff]  ;;  %p1390_p2 = pnand %p1389_p0, %p2893_p1  ;;  %s1392_s14 = sshll.u32 %s1469_s13, 4  ;;  %s1393_s14 = int_to_ptr.vmem [resolvable:$false] %s1392_s14 }
  0x57   : > { %1230 = vmatprep.subr.mxu1 %v1662_v7  ;;  %272 = vmatprep.subr.mxu0 %v1662_v7  ;;  %2726 = vst [vmem:[#allocation16_spill] sm:$0xff] %v1732_v21  ;;  %2727 = vst [vmem:[#allocation17_spill] sm:$0xff] %v1737_v22  ;;  %v1742_v23 = vld [vmem:[%s1628_s11 + $0x48] sm:$0xff]  ;;  %v1747_v24 = vld [vmem:[%s1628_s11 + $0x40] sm:$0xff]  ;;  %s1394_s19 = scalar_lea.vmem %s1393_s14, 8192  ;;  %p1395_p7 = scmp.lt.s32.totalorder %s2540_s8, %s1393_s14 }
  0x58   : > { %1246 = vmatpush1.msra.mxu1 %v1667_v8  ;;  %273 = vmatpush1.msra.mxu0 %v1667_v8  ;;  %2728 = vst [vmem:[#allocation18_spill] sm:$0xff] %v1742_v23  ;;  %2729 = vst [vmem:[#allocation19_spill] sm:$0xff] %v1747_v24  ;;  %v1752_v25 = vld [vmem:[%s1628_s11 + $0x38] sm:$0xff]  ;;  %v1757_v26 = vld [vmem:[%s1628_s11 + $0x30] sm:$0xff]  ;;  %p1391_p3 = pneg %p1390_p2  ;;  %p1396_p8 = scmp.lt.s32.totalorder %s1394_s19, %s1388_s12 }
  0x59   : > { %1231 = vmatprep.subr.mxu1 %v1672_v9  ;;  %274 = vmatprep.subr.mxu0 %v1672_v9  ;;  %2730 = vst [vmem:[#allocation20_spill] sm:$0xff] %v1752_v25  ;;  %2731 = vst [vmem:[#allocation21_spill] sm:$0xff] %v1757_v26  ;;  %v1762_v27 = vld [vmem:[%s1628_s11 + $0x28] sm:$0xff]  ;;  %v1767_v28 = vld [vmem:[%s1628_s11 + $0x20] sm:$0xff] }
  0x5a   : > { %1247 = vmatpush1.msra.mxu1 %v1677_v10  ;;  %275 = vmatpush1.msra.mxu0 %v1677_v10  ;;  %2732 = vst [vmem:[#allocation22_spill] sm:$0xff] %v1762_v27  ;;  %2733 = vst [vmem:[#allocation23_spill] sm:$0xff] %v1767_v28  ;;  %v1772_v29 = vld [vmem:[%s1628_s11 + $0x18] sm:$0xff]  ;;  %v1777_v30 = vld [vmem:[%s1628_s11 + $0x10] sm:$0xff]  ;;  %p1397_p9 = por %p1396_p8, %p1395_p7 }
  0x5b   : > { %1232 = vmatprep.subr.mxu1 %v1682_v11  ;;  %276 = vmatprep.subr.mxu0 %v1682_v11  ;;  %2734 = vst [vmem:[#allocation24_spill] sm:$0xff] %v1772_v29  ;;  %2735 = vst [vmem:[#allocation25_spill] sm:$0xff] %v1777_v30  ;;  %v1782_v31 = vld [vmem:[%s1628_s11 + $0x8] sm:$0xff]  ;;  %v1787_v32 = vld [vmem:[%s1628_s11] sm:$0xff] }
  0x5c   : > { %1248 = vmatpush1.msra.mxu1 %v1687_v12  ;;  %277 = vmatpush1.msra.mxu0 %v1687_v12  ;;  %2736 = vst [vmem:[#allocation26_spill] sm:$0xff] %v1782_v31  ;;  %2737 = vst [vmem:[#allocation27_spill] sm:$0xff] %v1787_v32  ;;  %v1791_v33 = vld [vmem:[#allocation4 + $0x40] sm:$0xff]  ;;  %v1803_v35 = vld [vmem:[#allocation4 + $0x48] sm:$0xff]  ;;  %p1398_p10 = pnand %p1397_p9, %p1391_p3 }
  0x5d   : > { %1233 = vmatprep.subr.mxu1 %v1692_v13  ;;  %278 = vmatprep.subr.mxu0 %v1692_v13  ;;  %2738 = vst [vmem:[#allocation28_spill] sm:$0xff] %v1791_v33  ;;  %v1794_v34 = vld [vmem:[#allocation4] sm:$0xff]  ;;  %2739 = vst [vmem:[#allocation29_spill] sm:$0xff] %v1803_v35  ;;  %v1806_v36 = vld [vmem:[#allocation4 + $0x8] sm:$0xff] }
  0x5e   : > { %1249 = vmatpush1.msra.mxu1 %v1697_v14  ;;  %279 = vmatpush1.msra.mxu0 %v1697_v14  ;;  %v1811_v37 = vld [vmem:[#allocation4 + $0x50] sm:$0xff]  ;;  %v1819_v39 = vld [vmem:[#allocation4 + $0x58] sm:$0xff]  ;;  %v1827_v41 = vld [vmem:[#allocation4 + $0x60] sm:$0xff] }
  0x5f   : > { %1234 = vmatprep.subr.mxu1 %v1702_v15  ;;  %280 = vmatprep.subr.mxu0 %v1702_v15  ;;  %2740 = vst [vmem:[#allocation30_spill] sm:$0xff] %v1811_v37  ;;  %v1814_v38 = vld [vmem:[#allocation4 + $0x10] sm:$0xff]  ;;  %2742 = vst [vmem:[#allocation32_spill] sm:$0xff] %v1819_v39  ;;  %v1822_v40 = vld [vmem:[#allocation4 + $0x18] sm:$0xff] }
  0x60   : > { %1250 = vmatpush1.msra.mxu1 %v1707_v16  ;;  %281 = vmatpush1.msra.mxu0 %v1707_v16  ;;  %2741 = vst [vmem:[#allocation31_spill] sm:$0xff] %v1814_v38  ;;  %2743 = vst [vmem:[#allocation33_spill] sm:$0xff] %v1822_v40  ;;  %v1830_v42 = vld [vmem:[#allocation4 + $0x20] sm:$0xff]  ;;  %v1835_v43 = vld [vmem:[#allocation4 + $0x68] sm:$0xff] }
  0x61   : > { %1235 = vmatprep.subr.mxu1 %v1712_v17  ;;  %282 = vmatprep.subr.mxu0 %v1712_v17  ;;  %2744 = vst [vmem:[#allocation34_spill] sm:$0xff] %v1827_v41  ;;  %2745 = vst [vmem:[#allocation35_spill] sm:$0xff] %v1830_v42  ;;  %v1838_v44 = vld [vmem:[#allocation4 + $0x28] sm:$0xff]  ;;  %v1843_v45 = vld [vmem:[#allocation4 + $0x70] sm:$0xff] }
  0x62   : > { %1251 = vmatpush1.msra.mxu1 %v1717_v18  ;;  %283 = vmatpush1.msra.mxu0 %v1717_v18  ;;  %2746 = vst [vmem:[#allocation36_spill] sm:$0xff] %v1835_v43  ;;  %2747 = vst [vmem:[#allocation37_spill] sm:$0xff] %v1838_v44  ;;  %v1846_v46 = vld [vmem:[#allocation4 + $0x30] sm:$0xff]  ;;  %v1851_v47 = vld [vmem:[#allocation4 + $0x78] sm:$0xff] }
  0x63   : > { %1236 = vmatprep.subr.mxu1 %v1722_v19  ;;  %284 = vmatprep.subr.mxu0 %v1722_v19  ;;  %2748 = vst [vmem:[#allocation38_spill] sm:$0xff] %v1843_v45  ;;  %2749 = vst [vmem:[#allocation39_spill] sm:$0xff] %v1846_v46  ;;  %v1854_v48 = vld [vmem:[#allocation4 + $0x38] sm:$0xff] }
  0x64   : > { %1252 = vmatpush1.msra.mxu1 %v1727_v20  ;;  %285 = vmatpush1.msra.mxu0 %v1727_v20  ;;  %2750 = vst [vmem:[#allocation40_spill] sm:$0xff] %v1851_v47  ;;  %2751 = vst [vmem:[#allocation41_spill] sm:$0xff] %v1854_v48 }
  0x65   : > { %1237 = vmatprep.subr.mxu1 %v1732_v21  ;;  %286 = vmatprep.subr.mxu0 %v1732_v21 }
  0x66   : > { %1253 = vmatpush1.msra.mxu1 %v1737_v22  ;;  %287 = vmatpush1.msra.mxu0 %v1737_v22 }
  0x67   : > { %1238 = vmatprep.subr.mxu1 %v1742_v23  ;;  %288 = vmatprep.subr.mxu0 %v1742_v23 }
  0x68   : > { %1254 = vmatpush1.msra.mxu1 %v1747_v24  ;;  %289 = vmatpush1.msra.mxu0 %v1747_v24 }
  0x69   : > { %1239 = vmatprep.subr.mxu1 %v1752_v25  ;;  %290 = vmatprep.subr.mxu0 %v1752_v25 }
  0x6a   : > { %1255 = vmatpush1.msra.mxu1 %v1757_v26  ;;  %291 = vmatpush1.msra.mxu0 %v1757_v26 }
  0x6b   : > { %1240 = vmatprep.subr.mxu1 %v1762_v27  ;;  %292 = vmatprep.subr.mxu0 %v1762_v27 }
  0x6c   : > { %1256 = vmatpush1.msra.mxu1 %v1767_v28  ;;  %293 = vmatpush1.msra.mxu0 %v1767_v28 }
  0x6d   : > { %1241 = vmatprep.subr.mxu1 %v1772_v29  ;;  %294 = vmatprep.subr.mxu0 %v1772_v29 }
  0x6e   : > { %1257 = vmatpush1.msra.mxu1 %v1777_v30  ;;  %295 = vmatpush1.msra.mxu0 %v1777_v30 }
  0x6f   : > { %1242 = vmatprep.subr.mxu1 %v1782_v31  ;;  %296 = vmatprep.subr.mxu0 %v1782_v31 }
  0x70   : > { %1258 = vmatpush1.msra.mxu1 %v1787_v32  ;;  %297 = vmatpush1.msra.mxu0 %v1787_v32 }
  0x71   : > { %379 = vmatmul.mubr.f32.vlgmr.msra.gmra.mxu1 %v1791_v33  ;;  %331 = vmatmul.mubr.f32.vlgmr.msra.gmra.mxu0 %v1794_v34 }
  0x72   : > { %384 = vmatprep.mubr.f32.mxu1 %v2593_v0  ;;  %336 = vmatprep.mubr.f32.mxu0 %v2593_v0 }
  0x75   : > { %385 = vmatmul.mubr.f32.gmra.mxu1 %v1803_v35  ;;  %337 = vmatmul.mubr.f32.gmra.mxu0 %v1806_v36 }
  0x76   : > { %390 = vmatprep.mubr.f32.mxu1 %v2593_v0  ;;  %342 = vmatprep.mubr.f32.mxu0 %v2593_v0 }
  0x79   : > { %391 = vmatmul.mubr.f32.gmra.mxu1 %v1811_v37  ;;  %343 = vmatmul.mubr.f32.gmra.mxu0 %v1814_v38 }
  0x7a   : > { %396 = vmatprep.mubr.f32.mxu1 %v2593_v0  ;;  %348 = vmatprep.mubr.f32.mxu0 %v2593_v0 }
  0x7d   : > { %397 = vmatmul.mubr.f32.gmra.mxu1 %v1819_v39  ;;  %349 = vmatmul.mubr.f32.gmra.mxu0 %v1822_v40 }
  0x7e   : > { %402 = vmatprep.mubr.f32.mxu1 %v2593_v0  ;;  %354 = vmatprep.mubr.f32.mxu0 %v2593_v0 }
  0x81   : > { %403 = vmatmul.mubr.f32.gmra.mxu1 %v1827_v41  ;;  %355 = vmatmul.mubr.f32.gmra.mxu0 %v1830_v42 }
  0x82   : > { %408 = vmatprep.mubr.f32.mxu1 %v2593_v0  ;;  %360 = vmatprep.mubr.f32.mxu0 %v2593_v0 }
  0x85   : > { %409 = vmatmul.mubr.f32.gmra.mxu1 %v1835_v43  ;;  %361 = vmatmul.mubr.f32.gmra.mxu0 %v1838_v44 }
  0x86   : > { %414 = vmatprep.mubr.f32.mxu1 %v2593_v0  ;;  %366 = vmatprep.mubr.f32.mxu0 %v2593_v0 }
  0x89   : > { %415 = vmatmul.mubr.f32.gmra.mxu1 %v1843_v45  ;;  %367 = vmatmul.mubr.f32.gmra.mxu0 %v1846_v46 }
  0x8a   : > { %420 = vmatprep.mubr.f32.mxu1 %v2593_v0  ;;  %372 = vmatprep.mubr.f32.mxu0 %v2593_v0 }
  0x8d   : > { %421 = vmatmul.mubr.f32.gmra.mxu1 %v1851_v47  ;;  %373 = vmatmul.mubr.f32.gmra.mxu0 %v1854_v48 }
  0x8e   : > { %557 = vmatprep.mubr.f32.mxu1 %v2593_v0  ;;  %848 = vmatprep.mubr.f32.mxu0 %v2593_v0 }
 0x131   : > { %v1860_v49 = vpop.f32.mrf.mxu1  ;;  %v1862_v50 = vpop.f32.mrf.mxu0 }
 0x132   : > { %2752 = vst [vmem:[#allocation42_spill] sm:$0xff] %v1860_v49  ;;  %2753 = vst [vmem:[#allocation43_spill] sm:$0xff] %v1862_v50 }
 0x133   : > { %v1864_v51 = vpop.f32.mrf.mxu1  ;;  %v1866_v52 = vpop.f32.mrf.mxu0 }
 0x134   : > { %2754 = vst [vmem:[#allocation44_spill] sm:$0xff] %v1864_v51  ;;  %2755 = vst [vmem:[#allocation45_spill] sm:$0xff] %v1866_v52 }
 0x135   : > { %v1868_v53 = vpop.f32.mrf.mxu1  ;;  %v1870_v54 = vpop.f32.mrf.mxu0 }
 0x136   : > { %2756 = vst [vmem:[#allocation46_spill] sm:$0xff] %v1868_v53  ;;  %2757 = vst [vmem:[#allocation47_spill] sm:$0xff] %v1870_v54 }
 0x137   : > { %v1872_v55 = vpop.f32.mrf.mxu1  ;;  %v1874_v56 = vpop.f32.mrf.mxu0 }
 0x138   : > { %2758 = vst [vmem:[#allocation48_spill] sm:$0xff] %v1872_v55  ;;  %2759 = vst [vmem:[#allocation49_spill] sm:$0xff] %v1874_v56 }
 0x139   : > { %v1876_v57 = vpop.f32.mrf.mxu1  ;;  %v1878_v58 = vpop.f32.mrf.mxu0 }
 0x13a   : > { %2760 = vst [vmem:[#allocation50_spill] sm:$0xff] %v1876_v57  ;;  %2761 = vst [vmem:[#allocation51_spill] sm:$0xff] %v1878_v58 }
 0x13b   : > { %v1880_v59 = vpop.f32.mrf.mxu1  ;;  %v1882_v60 = vpop.f32.mrf.mxu0 }
 0x13c   : > { %2762 = vst [vmem:[#allocation52_spill] sm:$0xff] %v1880_v59  ;;  %2763 = vst [vmem:[#allocation53_spill] sm:$0xff] %v1882_v60 }
 0x13d   : > { %v1884_v61 = vpop.f32.mrf.mxu1  ;;  %v1886_v62 = vpop.f32.mrf.mxu0 }
 0x13e   : > { %2764 = vst [vmem:[#allocation54_spill] sm:$0xff] %v1884_v61  ;;  %2765 = vst [vmem:[#allocation55_spill] sm:$0xff] %v1886_v62 }
 0x13f   : > { %v1888_v63 = vpop.f32.mrf.mxu1  ;;  %v1890_v0 = vpop.f32.mrf.mxu0 }
 0x140   : > { %2766 = vst [vmem:[#allocation56_spill] sm:$0xff] %v1888_v63  ;;  %2767 = vst [vmem:[#allocation57_spill] sm:$0xff] %v1890_v0 }
 0x141   : > { %v1892_v32 = vpop.f32.mrf.mxu1  ;;  %v1896_v30 = vpop.f32.mrf.mxu0 }
 0x142   : > { %2768 = vst [vmem:[#allocation58_spill] sm:$0xff] %v1892_v32  ;;  %2770 = vst [vmem:[#allocation60_spill] sm:$0xff] %v1896_v30 }
 0x143   : > { %v1894_v31 = vpop.f32.mrf.mxu1  ;;  %v1902_v27 = vpop.f32.mrf.mxu0 }
 0x144   : > { %2769 = vst [vmem:[#allocation59_spill] sm:$0xff] %v1894_v31  ;;  %2773 = vst [vmem:[#allocation63_spill] sm:$0xff] %v1902_v27 }
 0x145   : > { %v1898_v29 = vpop.f32.mrf.mxu1  ;;  %v1908_v24 = vpop.f32.mrf.mxu0 }
 0x146   : > { %2771 = vst [vmem:[#allocation61_spill] sm:$0xff] %v1898_v29  ;;  %2776 = vst [vmem:[#allocation66_spill] sm:$0xff] %v1908_v24 }
 0x147   : > { %v1900_v28 = vpop.f32.mrf.mxu1  ;;  %v1914_v21 = vpop.f32.mrf.mxu0 }
 0x148   : > { %2772 = vst [vmem:[#allocation62_spill] sm:$0xff] %v1900_v28  ;;  %2779 = vst [vmem:[#allocation69_spill] sm:$0xff] %v1914_v21 }
 0x149   : > { %v1904_v26 = vpop.f32.mrf.mxu1  ;;  %v1920_v20 = vpop.f32.mrf.mxu0 }
 0x14a   : > { %2774 = vst [vmem:[#allocation64_spill] sm:$0xff] %v1904_v26  ;;  %2780 = vst [vmem:[#allocation70_spill] sm:$0xff] %v1920_v20 }
 0x14b   : > { %v1906_v25 = vpop.f32.mrf.mxu1  ;;  %v1926_v19 = vpop.f32.mrf.mxu0 }
 0x14c   : > { %2775 = vst [vmem:[#allocation65_spill] sm:$0xff] %v1906_v25  ;;  %2781 = vst [vmem:[#allocation71_spill] sm:$0xff] %v1926_v19 }
 0x14d   : > { %v1910_v23 = vpop.f32.mrf.mxu1 }
 0x14e   : > { %2777 = vst [vmem:[#allocation67_spill] sm:$0xff] %v1910_v23 }
 0x14f   : > { %v1912_v22 = vpop.f32.mrf.mxu1 }
 0x150   : > { %2778 = vst [vmem:[#allocation68_spill] sm:$0xff] %v1912_v22  ;;  %493 = vmatprep.subr.mxu1 %v1912_v22  ;;  %v1931_v22 = vpop.f32.mrf.mxu0 }
 0x151   : > { %494 = vmatpush1.msra.mxu1 %v1910_v23  ;;  %2782 = vst [vmem:[#allocation72_spill] sm:$0xff] %v1931_v22 }
 0x152   : > { %495 = vmatprep.subr.mxu1 %v1906_v25  ;;  %v1937_v23 = vpop.f32.mrf.mxu0  ;;  %v2784_v25 = vmov 0.0  }
 0x153   : > { %496 = vmatpush1.msra.mxu1 %v1904_v26  ;;  %2783 = vst [vmem:[#allocation73_spill] sm:$0xff] %v1937_v23 }
 0x154   : > { %497 = vmatprep.subr.mxu1 %v1900_v28 }
 0x155   : > { %498 = vmatpush1.msra.mxu1 %v1898_v29 }
 0x156   : > { %499 = vmatprep.subr.mxu1 %v1894_v31 }
 0x157   : > { %500 = vmatpush1.msra.mxu1 %v1892_v32 }
 0x158   : > { %501 = vmatprep.subr.mxu1 %v1888_v63 }
 0x159   : > { %502 = vmatpush1.msra.mxu1 %v1884_v61 }
 0x15a   : > { %503 = vmatprep.subr.mxu1 %v1880_v59 }
 0x15b   : > { %504 = vmatpush1.msra.mxu1 %v1876_v57 }
 0x15c   : > { %505 = vmatprep.subr.mxu1 %v1872_v55 }
 0x15d   : > { %506 = vmatpush1.msra.mxu1 %v1868_v53 }
 0x15e   : > { %507 = vmatprep.subr.mxu1 %v1864_v51 }
 0x15f   : > { %508 = vmatpush1.msra.mxu1 %v1860_v49 }
 0x160   : > { %509 = vmatprep.subr.mxu1 %v1937_v23 }
 0x161   : > { %510 = vmatpush1.msra.mxu1 %v1931_v22 }
 0x162   : > { %511 = vmatprep.subr.mxu1 %v1926_v19 }
 0x163   : > { %512 = vmatpush1.msra.mxu1 %v1920_v20 }
 0x164   : > { %513 = vmatprep.subr.mxu1 %v1914_v21 }
 0x165   : > { %514 = vmatpush1.msra.mxu1 %v1908_v24 }
 0x166   : > { %515 = vmatprep.subr.mxu1 %v1902_v27 }
 0x167   : > { %516 = vmatpush1.msra.mxu1 %v1896_v30 }
 0x168   : > { %517 = vmatprep.subr.mxu1 %v1890_v0 }
 0x169   : > { %518 = vmatpush1.msra.mxu1 %v1886_v62 }
 0x16a   : > { %519 = vmatprep.subr.mxu1 %v1882_v60 }
 0x16b   : > { %520 = vmatpush1.msra.mxu1 %v1878_v58 }
 0x16c   : > { %521 = vmatprep.subr.mxu1 %v1874_v56 }
 0x16d   : > { %522 = vmatpush1.msra.mxu1 %v1870_v54 }
 0x16e   : > { %523 = vmatprep.subr.mxu1 %v1866_v52 }
 0x16f   : > { %524 = vmatpush1.msra.mxu1 %v1862_v50 }
 0x170   : > { %558 = vmatmul.mubr.f32.vlgmr.msra.gmra.mxu1 %v1794_v34 }
 0x171   : > { %563 = vmatprep.mubr.f32.mxu1 %v2784_v25 }
 0x174   : > { %564 = vmatmul.mubr.f32.gmra.mxu1 %v1806_v36 }
 0x175   : > { %569 = vmatprep.mubr.f32.mxu1 %v2784_v25 }
 0x178   : > { %570 = vmatmul.mubr.f32.gmra.mxu1 %v1814_v38 }
 0x179   : > { %575 = vmatprep.mubr.f32.mxu1 %v2784_v25 }
 0x17c   : > { %576 = vmatmul.mubr.f32.gmra.mxu1 %v1822_v40 }
 0x17d   : > { %581 = vmatprep.mubr.f32.mxu1 %v2784_v25 }
 0x180   : > { %582 = vmatmul.mubr.f32.gmra.mxu1 %v1830_v42 }
 0x181   : > { %587 = vmatprep.mubr.f32.mxu1 %v2784_v25 }
 0x184   : > { %588 = vmatmul.mubr.f32.gmra.mxu1 %v1838_v44 }
 0x185   : > { %593 = vmatprep.mubr.f32.mxu1 %v2784_v25 }
 0x188   : > { %594 = vmatmul.mubr.f32.gmra.mxu1 %v1846_v46 }
 0x189   : > { %599 = vmatprep.mubr.f32.mxu1 %v2784_v25 }
 0x18c   : > { %600 = vmatmul.mubr.f32.gmra.mxu1 %v1854_v48 }
 0x18d   : > { %605 = vmatprep.mubr.f32.mxu1 %v2784_v25 }
 0x190   : > { %606 = vmatmul.mubr.f32.gmra.mxu1 %v1791_v33 }
 0x191   : > { %611 = vmatprep.mubr.f32.mxu1 %v2784_v25 }
 0x194   : > { %612 = vmatmul.mubr.f32.gmra.mxu1 %v1803_v35 }
 0x195   : > { %617 = vmatprep.mubr.f32.mxu1 %v2784_v25 }
 0x198   : > { %618 = vmatmul.mubr.f32.gmra.mxu1 %v1811_v37 }
 0x199   : > { %623 = vmatprep.mubr.f32.mxu1 %v2784_v25 }
 0x19c   : > { %624 = vmatmul.mubr.f32.gmra.mxu1 %v1819_v39 }
 0x19d   : > { %629 = vmatprep.mubr.f32.mxu1 %v2784_v25 }
 0x1a0   : > { %630 = vmatmul.mubr.f32.gmra.mxu1 %v1827_v41 }
 0x1a1   : > { %635 = vmatprep.mubr.f32.mxu1 %v2784_v25 }
 0x1a4   : > { %636 = vmatmul.mubr.f32.gmra.mxu1 %v1835_v43 }
 0x1a5   : > { %641 = vmatprep.mubr.f32.mxu1 %v2784_v25 }
 0x1a8   : > { %642 = vmatmul.mubr.f32.gmra.mxu1 %v1843_v45 }
 0x1a9   : > { %647 = vmatprep.mubr.f32.mxu1 %v2784_v25 }
 0x1ac   : > { %648 = vmatmul.mubr.f32.gmra.mxu1 %v1851_v47 }
 0x230   : > { %v1987_v26 = vpop.f32.mrf.mxu1 }
 0x232   : > { %v1989_v28 = vpop.f32.mrf.mxu1 }
 0x234   : > { %v1991_v29 = vpop.f32.mrf.mxu1 }
 0x236   : > { %v1993_v31 = vpop.f32.mrf.mxu1 }
 0x238   : > { %v1995_v32 = vpop.f32.mrf.mxu1 }
 0x23a   : > { %v1997_v63 = vpop.f32.mrf.mxu1 }
 0x23c   : > { %v1999_v61 = vpop.f32.mrf.mxu1 }
 0x23e   : > { %v2001_v59 = vpop.f32.mrf.mxu1 }
 0x240   : > { %v2003_v57 = vpop.f32.mrf.mxu1 }
 0x242   : > { %v2005_v55 = vpop.f32.mrf.mxu1 }
 0x244   : > { %v2007_v53 = vpop.f32.mrf.mxu1 }
 0x246   : > { %v2009_v51 = vpop.f32.mrf.mxu1 }
 0x248   : > { %v2011_v49 = vpop.f32.mrf.mxu1 }
 0x24a   : > { %v597_v23 = vpop.f32.mrf.mxu1 }
 0x24c   : > { %v601_v22 = vpop.f32.mrf.mxu1 }
 0x24e   : > { %v603_v19 = vpop.f32.mrf.mxu1 }
 0x250   : > { %v607_v20 = vpop.f32.mrf.mxu1 }
 0x252   : > { %v609_v21 = vpop.f32.mrf.mxu1 }
 0x254   : > { %v613_v24 = vpop.f32.mrf.mxu1 }
 0x256   : > { %v615_v27 = vpop.f32.mrf.mxu1 }
 0x258   : > { %v619_v30 = vpop.f32.mrf.mxu1 }
 0x25a   : > { %v621_v0 = vpop.f32.mrf.mxu1 }
 0x25c   : > { %v625_v62 = vpop.f32.mrf.mxu1 }
 0x25e   : > { %v627_v60 = vpop.f32.mrf.mxu1 }
 0x260   : > { %v631_v58 = vpop.f32.mrf.mxu1 }
 0x261   : > { %v678_v38 = vmul.f32 2.0, %v631_v58  ;;  %v668_v58 = vmul.f32 2.0, %v601_v22  ;;  %v665_v22 = vmul.f32 2.0, %v2009_v51  ;;  %v662_v51 = vmul.f32 2.0, %v2003_v57 }
 0x262   : > { %v633_v56 = vpop.f32.mrf.mxu1  ;;  %v659_v57 = vmul.f32 2.0, %v1997_v63  ;;  %v656_v63 = vmul.f32 2.0, %v1991_v29  ;;  %v2807_v29 = vld [vmem:[#allocation24_spill] sm:$0xff] }
 0x263   : > { %v679_v42 = vmul.f32 2.0, %v633_v56  ;;  %v669_v56 = vmul.f32 2.0, %v603_v19 }
 0x264   : > { %v637_v54 = vpop.f32.mrf.mxu1 }
 0x265   : > { %v680_v46 = vmul.f32 2.0, %v637_v54 }
 0x266   : > { %v639_v52 = vpop.f32.mrf.mxu1 }
 0x267   : > { %v681_v33 = vmul.f32 2.0, %v639_v52  ;;  %v2040_v52 = vsub.f32 %v678_v38, %v1667_v8  ;;  %v670_v38 = vmul.f32 2.0, %v607_v20 }
 0x268   : > { %v643_v50 = vpop.f32.mrf.mxu1 }
 0x269   : > { %v682_v35 = vmul.f32 2.0, %v643_v50  ;;  %v2036_v50 = vsub.f32 %v679_v42, %v1662_v7  ;;  %2792 = vst [vmem:[#allocation81_spill] sm:$0xff] %v2040_v52  ;;  %v671_v42 = vmul.f32 2.0, %v609_v21  ;;  %v2073_v19 = vsub.f32 %v670_v38, %v1707_v16 }
 0x26a   : > { %v645_v47 = vpop.f32.mrf.mxu1 }
 0x26b   : > { %v683_v39 = vmul.f32 2.0, %v645_v47  ;;  %v2032_v47 = vsub.f32 %v680_v46, %v1657_v6  ;;  %2791 = vst [vmem:[#allocation80_spill] sm:$0xff] %v2036_v50  ;;  %v672_v46 = vmul.f32 2.0, %v613_v24  ;;  %v2068_v20 = vsub.f32 %v671_v42, %v1702_v15  ;;  %v2799_v42 = vld [vmem:[#allocation16_spill] sm:$0xff] }
 0x26c   : > { %v649_v45 = vpop.f32.mrf.mxu1  ;;  %v2098_v38 = vsub.f32 %v665_v22, %v2799_v42  ;;  %v2802_v22 = vld [vmem:[#allocation19_spill] sm:$0xff] }
 0x26d   : > { %v684_v43 = vmul.f32 2.0, %v649_v45  ;;  %v2020_v40 = vsub.f32 %v683_v39, %v1643_v3  ;;  %v2024_v45 = vsub.f32 %v682_v35, %v1647_v4  ;;  %2790 = vst [vmem:[#allocation79_spill] sm:$0xff] %v2032_v47  ;;  %v675_v39 = vmul.f32 2.0, %v621_v0 }
 0x26e   : > { %v651_v41 = vpop.f32.mrf.mxu1  ;;  %v674_v35 = vmul.f32 2.0, %v619_v30  ;;  %v2064_v21 = vsub.f32 %v672_v46, %v1697_v14 }
 0x26f   : > { %v685_v37 = vmul.f32 2.0, %v651_v41  ;;  %v2017_v44 = vsub.f32 %v684_v43, %v1640_v2  ;;  %2787 = vst [vmem:[#allocation76_spill] sm:$0xff] %v2020_v40  ;;  %2788 = vst [vmem:[#allocation77_spill] sm:$0xff] %v2024_v45  ;;  %v677_v41 = vmul.f32 2.0, %v627_v60  ;;  %v676_v43 = vmul.f32 2.0, %v625_v62 }
 0x270   : > { %v2052_v30 = vsub.f32 %v675_v39, %v1682_v11  ;;  %v667_v60 = vmul.f32 2.0, %v597_v23  ;;  %v666_v62 = vmul.f32 2.0, %v2011_v49  ;;  %v664_v23 = vmul.f32 2.0, %v2007_v53  ;;  %v2797_v39 = vld [vmem:[#allocation14_spill] sm:$0xff] }
 0x271   : > { %v2014_v48 = vsub.f32 %v685_v37, %v1637_v1  ;;  %2786 = vst [vmem:[#allocation75_spill] sm:$0xff] %v2017_v44  ;;  %v2028_v37 = vsub.f32 %v681_v33, %v1652_v5  ;;  %v673_v33 = vmul.f32 2.0, %v615_v27  ;;  %v2044_v54 = vsub.f32 %v677_v41, %v1672_v9 }
 0x272   : > { %v2048_v0 = vsub.f32 %v676_v43, %v1677_v10  ;;  %2795 = vst [vmem:[#allocation84_spill] sm:$0xff] %v2052_v30  ;;  %v2056_v27 = vsub.f32 %v674_v35, %v1687_v12  ;;  %v2078_v41 = vsub.f32 %v669_v56, %v1712_v17  ;;  %v2083_v43 = vsub.f32 %v668_v58, %v1717_v18  ;;  %v2800_v56 = vld [vmem:[#allocation17_spill] sm:$0xff] }
 0x273   : > { %2785 = vst [vmem:[#allocation74_spill] sm:$0xff] %v2014_v48  ;;  %784 = vmatprep.subr.mxu0 %v2014_v48  ;;  %2789 = vst [vmem:[#allocation78_spill] sm:$0xff] %v2028_v37  ;;  %v2060_v24 = vsub.f32 %v673_v33, %v1692_v13  ;;  %v663_v49 = vmul.f32 2.0, %v2005_v55  ;;  %v2088_v35 = vsub.f32 %v667_v60, %v2797_v39  ;;  %v2798_v33 = vld [vmem:[#allocation15_spill] sm:$0xff]  ;;  %v661_v53 = vmul.f32 2.0, %v2001_v59  ;;  %v2801_v60 = vld [vmem:[#allocation18_spill] sm:$0xff] }
 0x274   : > { %785 = vmatpush1.msra.mxu0 %v2017_v44  ;;  %2793 = vst [vmem:[#allocation82_spill] sm:$0xff] %v2044_v54  ;;  %2794 = vst [vmem:[#allocation83_spill] sm:$0xff] %v2048_v0  ;;  %v2093_v46 = vsub.f32 %v666_v62, %v2798_v33  ;;  %v660_v55 = vmul.f32 2.0, %v1999_v61  ;;  %v2103_v58 = vsub.f32 %v664_v23, %v2800_v56  ;;  %v658_v59 = vmul.f32 2.0, %v1995_v32  ;;  %v2803_v23 = vld [vmem:[#allocation20_spill] sm:$0xff] }
 0x275   : > { %786 = vmatprep.subr.mxu0 %v2020_v40  ;;  %2796 = vst [vmem:[#allocation85_spill] sm:$0xff] %v2056_v27  ;;  %v2108_v62 = vsub.f32 %v663_v49, %v2801_v60  ;;  %v2113_v48 = vsub.f32 %v662_v51, %v2802_v22  ;;  %v657_v61 = vmul.f32 2.0, %v1993_v31  ;;  %v2118_v44 = vsub.f32 %v661_v53, %v2803_v23  ;;  %v2804_v49 = vld [vmem:[#allocation21_spill] sm:$0xff]  ;;  %v2805_v51 = vld [vmem:[#allocation22_spill] sm:$0xff]  ;;  %v2806_v53 = vld [vmem:[#allocation23_spill] sm:$0xff] }
 0x276   : > { %787 = vmatpush1.msra.mxu0 %v2024_v45  ;;  %v2123_v40 = vsub.f32 %v660_v55, %v2804_v49  ;;  %v655_v32 = vmul.f32 2.0, %v1989_v28  ;;  %v2128_v45 = vsub.f32 %v659_v57, %v2805_v51  ;;  %v654_v31 = vmul.f32 2.0, %v1987_v26  ;;  %v2808_v55 = vld [vmem:[#allocation25_spill] sm:$0xff]  ;;  %v2809_v28 = vld [vmem:[#allocation26_spill] sm:$0xff]  ;;  %v2810_v26 = vld [vmem:[#allocation27_spill] sm:$0xff] }
 0x277   : > { %788 = vmatprep.subr.mxu0 %v2028_v37  ;;  %v2133_v37 = vsub.f32 %v658_v59, %v2806_v53 }
 0x278   : > { %789 = vmatpush1.msra.mxu0 %v2032_v47  ;;  %v2137_v47 = vsub.f32 %v657_v61, %v2807_v29  ;;  %v2145_v57 = vsub.f32 %v655_v32, %v2809_v28  ;;  %v2149_v59 = vsub.f32 %v654_v31, %v2810_v26  ;;  %v2811_v61 = vld [vmem:[#allocation31_spill] sm:$0xff]  ;;  %v2814_v31 = vld [vmem:[#allocation37_spill] sm:$0xff] }
 0x279   : > { %790 = vmatprep.subr.mxu0 %v2036_v50  ;;  %v2141_v50 = vsub.f32 %v656_v63, %v2808_v55  ;;  %v2812_v63 = vld [vmem:[#allocation33_spill] sm:$0xff]  ;;  %v2813_v32 = vld [vmem:[#allocation35_spill] sm:$0xff] }
 0x27a   : > { %791 = vmatpush1.msra.mxu0 %v2040_v52 }
 0x27b   : > { %792 = vmatprep.subr.mxu0 %v2044_v54 }
 0x27c   : > { %793 = vmatpush1.msra.mxu0 %v2048_v0 }
 0x27d   : > { %794 = vmatprep.subr.mxu0 %v2052_v30 }
 0x27e   : > { %795 = vmatpush1.msra.mxu0 %v2056_v27  ;;  %v2842_v27 = vld [vmem:[#allocation53_spill] sm:$0xff] }
 0x27f   : > { %796 = vmatprep.subr.mxu0 %v2060_v24 }
 0x280   : > { %797 = vmatpush1.msra.mxu0 %v2064_v21 }
 0x281   : > { %798 = vmatprep.subr.mxu0 %v2068_v20 }
 0x282   : > { %799 = vmatpush1.msra.mxu0 %v2073_v19 }
 0x283   : > { %800 = vmatprep.subr.mxu0 %v2078_v41 }
 0x284   : > { %801 = vmatpush1.msra.mxu0 %v2083_v43 }
 0x285   : > { %802 = vmatprep.subr.mxu0 %v2088_v35 }
 0x286   : > { %803 = vmatpush1.msra.mxu0 %v2093_v46 }
 0x287   : > { %804 = vmatprep.subr.mxu0 %v2098_v38 }
 0x288   : > { %805 = vmatpush1.msra.mxu0 %v2103_v58 }
 0x289   : > { %806 = vmatprep.subr.mxu0 %v2108_v62 }
 0x28a   : > { %807 = vmatpush1.msra.mxu0 %v2113_v48 }
 0x28b   : > { %808 = vmatprep.subr.mxu0 %v2118_v44 }
 0x28c   : > { %809 = vmatpush1.msra.mxu0 %v2123_v40 }
 0x28d   : > { %810 = vmatprep.subr.mxu0 %v2128_v45 }
 0x28e   : > { %811 = vmatpush1.msra.mxu0 %v2133_v37 }
 0x28f   : > { %812 = vmatprep.subr.mxu0 %v2137_v47 }
 0x290   : > { %813 = vmatpush1.msra.mxu0 %v2141_v50 }
 0x291   : > { %814 = vmatprep.subr.mxu0 %v2145_v57 }
 0x292   : > { %815 = vmatpush1.msra.mxu0 %v2149_v59 }
 0x293   : > { %849 = vmatmul.mubr.f32.vlgmr.msra.gmra.mxu0 %v1794_v34  ;;  %v2815_v34 = vld [vmem:[#allocation39_spill] sm:$0xff] }
 0x294   : > { %854 = vmatprep.mubr.f32.mxu0 %v2784_v25 }
 0x297   : > { %855 = vmatmul.mubr.f32.gmra.mxu0 %v1806_v36  ;;  %v2816_v36 = vld [vmem:[#allocation41_spill] sm:$0xff] }
 0x298   : > { %860 = vmatprep.mubr.f32.mxu0 %v2784_v25 }
 0x29b   : > { %861 = vmatmul.mubr.f32.gmra.mxu0 %v2811_v61  ;;  %v2817_v61 = vld [vmem:[#allocation28_spill] sm:$0xff] }
 0x29c   : > { %866 = vmatprep.mubr.f32.mxu0 %v2784_v25 }
 0x29f   : > { %867 = vmatmul.mubr.f32.gmra.mxu0 %v2812_v63  ;;  %v2818_v63 = vld [vmem:[#allocation29_spill] sm:$0xff] }
 0x2a0   : > { %872 = vmatprep.mubr.f32.mxu0 %v2784_v25 }
 0x2a3   : > { %873 = vmatmul.mubr.f32.gmra.mxu0 %v2813_v32  ;;  %v2819_v32 = vld [vmem:[#allocation30_spill] sm:$0xff] }
 0x2a4   : > { %878 = vmatprep.mubr.f32.mxu0 %v2784_v25 }
 0x2a7   : > { %879 = vmatmul.mubr.f32.gmra.mxu0 %v2814_v31  ;;  %v2820_v31 = vld [vmem:[#allocation32_spill] sm:$0xff] }
 0x2a8   : > { %884 = vmatprep.mubr.f32.mxu0 %v2784_v25 }
 0x2ab   : > { %885 = vmatmul.mubr.f32.gmra.mxu0 %v2815_v34  ;;  %v2821_v34 = vld [vmem:[#allocation34_spill] sm:$0xff] }
 0x2ac   : > { %890 = vmatprep.mubr.f32.mxu0 %v2784_v25 }
 0x2af   : > { %891 = vmatmul.mubr.f32.gmra.mxu0 %v2816_v36  ;;  %v2822_v36 = vld [vmem:[#allocation36_spill] sm:$0xff] }
 0x2b0   : > { %896 = vmatprep.mubr.f32.mxu0 %v2784_v25 }
 0x2b3   : > { %897 = vmatmul.mubr.f32.gmra.mxu0 %v2817_v61  ;;  %v2823_v61 = vld [vmem:[#allocation38_spill] sm:$0xff] }
 0x2b4   : > { %902 = vmatprep.mubr.f32.mxu0 %v2784_v25 }
 0x2b7   : > { %903 = vmatmul.mubr.f32.gmra.mxu0 %v2818_v63  ;;  %v2824_v63 = vld [vmem:[#allocation40_spill] sm:$0xff] }
 0x2b8   : > { %908 = vmatprep.mubr.f32.mxu0 %v2784_v25 }
 0x2bb   : > { %909 = vmatmul.mubr.f32.gmra.mxu0 %v2819_v32  ;;  %v233_v32 = vstv %s232_s25 }
 0x2bc   : > { %914 = vmatprep.mubr.f32.mxu0 %v2784_v25  ;;  %v2191_v52 = vmul.f32 %v233_v32, %v1702_v15  ;;  %v234_v15 = vmul.f32 %v233_v32, %v2810_v26  ;;  %v2212_v54 = vmul.f32 %v233_v32, %v1672_v9  ;;  %v237_v0 = vmul.f32 %v233_v32, %v2807_v29 }
 0x2bd   : > { %v238_v26 = vmul.f32 %v233_v32, %v2806_v53  ;;  %v2228_v9 = vmul.f32 %v233_v32, %v1652_v5  ;;  %v2242_v29 = vstv %s1218_s21  ;;  %v2247_v5 = vmul.f32 %v233_v32, %v2803_v23 }
 0x2be   : > { %2828 = vst [vmem:[#allocation17_spill] sm:$0xff] %v2212_v54 }
 0x2bf   : > { %915 = vmatmul.mubr.f32.gmra.mxu0 %v2820_v31  ;;  %v2186_v31 = vmul.f32 %v233_v32, %v1707_v16  ;;  %v2208_v16 = vmul.f32 %v233_v32, %v1677_v10  ;;  %v2224_v10 = vmul.f32 %v233_v32, %v1657_v6  ;;  %2832 = vst [vmem:[#allocation21_spill] sm:$0xff] %v2228_v9  ;;  %v2835_v6 = vld [vmem:[#allocation43_spill] sm:$0xff] }
 0x2c0   : > { %920 = vmatprep.mubr.f32.mxu0 %v2784_v25  ;;  %v2264_v9 = vmul.f32 %v233_v32, %v2800_v56  ;;  %v721_v56 = vmul.f32 %v2242_v29, %v2145_v57  ;;  %v722_v57 = vmul.f32 %v2242_v29, %v2141_v50 }
 0x2c1   : > { %2827 = vst [vmem:[#allocation16_spill] sm:$0xff] %v2208_v16  ;;  %2831 = vst [vmem:[#allocation20_spill] sm:$0xff] %v2224_v10  ;;  %v2267_v10 = vmul.f32 %v233_v32, %v2799_v42  ;;  %v2840_v16 = vld [vmem:[#allocation49_spill] sm:$0xff] }
 0x2c3   : > { %921 = vmatmul.mubr.f32.gmra.mxu0 %v2821_v34  ;;  %v2188_v34 = vstv %s1217_s28 }
 0x2c4   : > { %926 = vmatprep.mubr.f32.mxu0 %v2784_v25  ;;  %v429_v53 = vmul.f32 %v2188_v34, %v2835_v6 }
 0x2c7   : > { %927 = vmatmul.mubr.f32.gmra.mxu0 %v2822_v36  ;;  %v2194_v36 = vmul.f32 %v233_v32, %v1697_v14  ;;  %v235_v14 = vmul.f32 %v233_v32, %v2809_v28  ;;  %v2231_v28 = vmul.f32 %v233_v32, %v2805_v51  ;;  %v2250_v51 = vmul.f32 %v233_v32, %v1640_v2 }
 0x2c8   : > { %932 = vmatprep.mubr.f32.mxu0 %v2784_v25  ;;  %v2270_v2 = vmul.f32 %v233_v32, %v2798_v33  ;;  %v2285_v33 = vmul.f32 %v233_v32, %v1717_v18 }
 0x2c9   : > { %2836 = vst [vmem:[#allocation24_spill] sm:$0xff] %v2250_v51 }
 0x2cb   : > { %933 = vmatmul.mubr.f32.gmra.mxu0 %v2823_v61  ;;  %v2197_v61 = vmul.f32 %v233_v32, %v1692_v13  ;;  %v2216_v13 = vmul.f32 %v233_v32, %v1667_v8  ;;  %v2234_v8 = vmul.f32 %v233_v32, %v1647_v4  ;;  %v2253_v4 = vmul.f32 %v233_v32, %v2802_v22 }
 0x2cc   : > { %938 = vmatprep.mubr.f32.mxu0 %v2784_v25  ;;  %v2200_v25 = vmul.f32 %v233_v32, %v1687_v12  ;;  %v236_v12 = vmul.f32 %v233_v32, %v2808_v55  ;;  %v2237_v55 = vmul.f32 %v233_v32, %v2804_v49  ;;  %v2837_v49 = vld [vmem:[#allocation45_spill] sm:$0xff]  ;;  %v720_v22 = vmul.f32 %v2242_v29, %v2149_v59 }
 0x2cd   : > { %2829 = vst [vmem:[#allocation18_spill] sm:$0xff] %v2216_v13  ;;  %2833 = vst [vmem:[#allocation22_spill] sm:$0xff] %v2234_v8  ;;  %v430_v8 = vmul.f32 %v2188_v34, %v2837_v49  ;;  %v461_v13 = vadd.f32 %v429_v53, %v234_v15 }
 0x2ce   : > { %2825 = vst [vmem:[#allocation14_spill] sm:$0xff] %v2200_v25 }
 0x2cf   : > { %939 = vmatmul.mubr.f32.gmra.mxu0 %v2824_v63  ;;  %v2203_v63 = vmul.f32 %v233_v32, %v1682_v11  ;;  %v2220_v11 = vmul.f32 %v233_v32, %v1662_v7  ;;  %v2240_v7 = vmul.f32 %v233_v32, %v1643_v3  ;;  %v2258_v3 = vmul.f32 %v233_v32, %v1637_v1 }
 0x2d0   : > { %v752_v25 = vadd.f32 %v720_v22, %v461_v13 }
 0x2d1   : > { %2826 = vst [vmem:[#allocation15_spill] sm:$0xff] %v2203_v63  ;;  %2830 = vst [vmem:[#allocation19_spill] sm:$0xff] %v2220_v11  ;;  %v2839_v11 = vld [vmem:[#allocation47_spill] sm:$0xff]  ;;  %v432_v63 = vmul.f32 %v2188_v34, %v2840_v16 }
 0x2d2   : > { %2834 = vst [vmem:[#allocation23_spill] sm:$0xff] %v2240_v7  ;;  %2838 = vst [vmem:[#allocation25_spill] sm:$0xff] %v2258_v3  ;;  %v2261_v7 = vmul.f32 %v233_v32, %v2801_v60  ;;  %v431_v1 = vmul.f32 %v2188_v34, %v2839_v11  ;;  %v2277_v60 = vmul.f32 %v233_v32, %v2797_v39  ;;  %v2282_v3 = vstv %s2205_s29 }
 0x2d3   : > { %v2291_v39 = vmul.f32 %v233_v32, %v1712_v17  ;;  %v723_v17 = vmul.f32 %v2242_v29, %v2137_v47 }
 0x353   : > { %v850_v23 = vpop.f32.mrf.mxu0 }
 0x354   : > { %v945_v51 = vmul.f32 2.0, %v850_v23  ;;  %v462_v23 = vadd.f32 %v430_v8, %v235_v14 }
 0x355   : > { %v852_v42 = vpop.f32.mrf.mxu0 }
 0x356   : > { %v977_v54 = vsub.f32 %v945_v51, %v2835_v6  ;;  %v946_v59 = vmul.f32 2.0, %v852_v42  ;;  %v463_v6 = vadd.f32 %v431_v1, %v236_v12  ;;  %v2841_v51 = vld [vmem:[#allocation51_spill] sm:$0xff]  ;;  %v753_v8 = vadd.f32 %v721_v56, %v462_v23 }
 0x357   : > { %v856_v30 = vpop.f32.mrf.mxu0  ;;  %v433_v14 = vmul.f32 %v2188_v34, %v2841_v51  ;;  %v724_v12 = vmul.f32 %v2242_v29, %v2133_v37  ;;  %v2843_v56 = vld [vmem:[#allocation55_spill] sm:$0xff]  ;;  %v725_v37 = vmul.f32 %v2242_v29, %v2128_v45 }
 0x358   : > { %v1011_v15 = vmul.f32 %v2282_v3, %v977_v54  ;;  %v978_v18 = vsub.f32 %v946_v59, %v2837_v49  ;;  %v947_v53 = vmul.f32 2.0, %v856_v30  ;;  %v464_v54 = vadd.f32 %v432_v63, %v237_v0 }
 0x359   : > { %v858_v32 = vpop.f32.mrf.mxu0  ;;  %v434_v49 = vmul.f32 %v2188_v34, %v2842_v27  ;;  %v754_v30 = vadd.f32 %v722_v57, %v463_v6  ;;  %v465_v63 = vadd.f32 %v433_v14, %v238_v26  ;;  %v435_v59 = vmul.f32 %v2188_v34, %v2843_v56 }
 0x35a   : > { %v1043_v42 = vadd.f32 %v1011_v15, %v752_v25  ;;  %v1012_v50 = vmul.f32 %v2282_v3, %v978_v18  ;;  %v979_v13 = vsub.f32 %v947_v53, %v2839_v11  ;;  %v948_v22 = vmul.f32 2.0, %v858_v32 }
 0x35b   : > { %v862_v1 = vpop.f32.mrf.mxu0  ;;  %v755_v23 = vadd.f32 %v723_v17, %v464_v54  ;;  %v756_v14 = vadd.f32 %v724_v12, %v465_v63  ;;  %v726_v17 = vmul.f32 %v2242_v29, %v2123_v40 }
 0x35c   : > { %1075 = vst [vmem:[%s2309_s24] sm:$0xff] %v1043_v42  ;;  %v1044_v47 = vadd.f32 %v1012_v50, %v753_v8  ;;  %v1013_v25 = vmul.f32 %v2282_v3, %v979_v13  ;;  %v980_v11 = vsub.f32 %v948_v22, %v2840_v16  ;;  %v949_v0 = vmul.f32 2.0, %v862_v1  ;;  %v2844_v8 = vld [vmem:[#allocation57_spill] sm:$0xff]  ;;  %v2845_v22 = vld [vmem:[#allocation60_spill] sm:$0xff] }
 0x35d   : > { %v864_v57 = vpop.f32.mrf.mxu0  ;;  %v466_v16 = vadd.f32 %v434_v49, %v2231_v28  ;;  %v436_v26 = vmul.f32 %v2188_v34, %v2844_v8  ;;  %v437_v28 = vmul.f32 %v2188_v34, %v2845_v22  ;;  %v727_v49 = vmul.f32 %v2242_v29, %v2118_v44 }
 0x35e   : > { %1076 = vst [vmem:[%s2309_s24 + $0x8] sm:$0xff] %v1044_v47  ;;  %v1045_v15 = vadd.f32 %v1013_v25, %v754_v30  ;;  %v1014_v18 = vmul.f32 %v2282_v3, %v980_v11  ;;  %v981_v53 = vsub.f32 %v949_v0, %v2841_v51  ;;  %v950_v6 = vmul.f32 2.0, %v864_v57  ;;  %v2846_v25 = vld [vmem:[#allocation63_spill] sm:$0xff]  ;;  %v2847_v57 = vld [vmem:[#allocation66_spill] sm:$0xff] }
 0x35f   : > { %v868_v32 = vpop.f32.mrf.mxu0  ;;  %v467_v51 = vadd.f32 %v435_v59, %v2237_v55  ;;  %v757_v54 = vadd.f32 %v725_v37, %v466_v16  ;;  %v438_v55 = vmul.f32 %v2188_v34, %v2846_v25  ;;  %v728_v0 = vmul.f32 %v2242_v29, %v2113_v48 }
 0x360   : > { %1077 = vst [vmem:[%s2309_s24 + $0x10] sm:$0xff] %v1045_v15  ;;  %v1046_v45 = vadd.f32 %v1014_v18, %v755_v23  ;;  %v1015_v42 = vmul.f32 %v2282_v3, %v981_v53  ;;  %v982_v50 = vsub.f32 %v950_v6, %v2842_v27  ;;  %v951_v13 = vmul.f32 2.0, %v868_v32 }
 0x361   : > { %v870_v30 = vpop.f32.mrf.mxu0  ;;  %v468_v27 = vadd.f32 %v436_v26, %v2247_v5  ;;  %v758_v11 = vadd.f32 %v726_v17, %v467_v51  ;;  %v439_v5 = vmul.f32 %v2188_v34, %v2847_v57  ;;  %v729_v18 = vmul.f32 %v2242_v29, %v2108_v62 }
 0x362   : > { %1078 = vst [vmem:[%s2309_s24 + $0x18] sm:$0xff] %v1046_v45  ;;  %v1047_v40 = vadd.f32 %v1015_v42, %v756_v14  ;;  %v1016_v12 = vmul.f32 %v2282_v3, %v982_v50  ;;  %v983_v1 = vsub.f32 %v951_v13, %v2843_v56  ;;  %v952_v47 = vmul.f32 2.0, %v870_v30  ;;  %v2848_v14 = vld [vmem:[#allocation69_spill] sm:$0xff] }
 0x363   : > { %v874_v63 = vpop.f32.mrf.mxu0  ;;  %v469_v56 = vadd.f32 %v437_v28, %v2253_v4  ;;  %v759_v15 = vadd.f32 %v727_v49, %v468_v27  ;;  %v440_v4 = vmul.f32 %v2188_v34, %v2848_v14  ;;  %v730_v32 = vmul.f32 %v2242_v29, %v2103_v58 }
 0x364   : > { %1079 = vst [vmem:[%s2309_s24 + $0x20] sm:$0xff] %v1047_v40  ;;  %v1048_v44 = vadd.f32 %v1016_v12, %v757_v54  ;;  %v1017_v59 = vmul.f32 %v2282_v3, %v983_v1  ;;  %v984_v23 = vsub.f32 %v952_v47, %v2844_v8  ;;  %v953_v37 = vmul.f32 2.0, %v874_v63  ;;  %v2850_v47 = vld [vmem:[#allocation71_spill] sm:$0xff] }
 0x365   : > { %v876_v53 = vpop.f32.mrf.mxu0  ;;  %v470_v8 = vadd.f32 %v438_v55, %v2261_v7  ;;  %v760_v17 = vadd.f32 %v728_v0, %v469_v56  ;;  %v471_v51 = vadd.f32 %v439_v5, %v2264_v9  ;;  %v731_v54 = vmul.f32 %v2242_v29, %v2098_v38 }
 0x366   : > { %1080 = vst [vmem:[%s2309_s24 + $0x28] sm:$0xff] %v1048_v44  ;;  %v1049_v48 = vadd.f32 %v1017_v59, %v758_v11  ;;  %v1018_v6 = vmul.f32 %v2282_v3, %v984_v23  ;;  %v985_v16 = vsub.f32 %v953_v37, %v2845_v22  ;;  %v954_v26 = vmul.f32 2.0, %v876_v53  ;;  %v2849_v22 = vld [vmem:[#allocation70_spill] sm:$0xff]  ;;  %v2851_v59 = vld [vmem:[#allocation72_spill] sm:$0xff]  ;;  %v2852_v53 = vld [vmem:[#allocation73_spill] sm:$0xff] }
 0x367   : > { %v880_v45 = vpop.f32.mrf.mxu0  ;;  %v441_v7 = vmul.f32 %v2188_v34, %v2849_v22  ;;  %v761_v28 = vadd.f32 %v729_v18, %v470_v8  ;;  %v472_v1 = vadd.f32 %v440_v4, %v2267_v10  ;;  %v442_v9 = vmul.f32 %v2188_v34, %v2850_v47  ;;  %v2853_v4 = vld [vmem:[#allocation42_spill] sm:$0xff] }
 0x368   : > { %1081 = vst [vmem:[%s2309_s24 + $0x30] sm:$0xff] %v1049_v48  ;;  %v1050_v62 = vadd.f32 %v1018_v6, %v759_v15  ;;  %v1019_v42 = vmul.f32 %v2282_v3, %v985_v16  ;;  %v986_v50 = vsub.f32 %v954_v26, %v2846_v25  ;;  %v955_v13 = vmul.f32 2.0, %v880_v45 }
 0x369   : > { %v882_v49 = vpop.f32.mrf.mxu0  ;;  %v762_v27 = vadd.f32 %v730_v32, %v471_v51  ;;  %v732_v25 = vmul.f32 %v2242_v29, %v2093_v46  ;;  %v473_v44 = vadd.f32 %v441_v7, %v2270_v2  ;;  %v443_v10 = vmul.f32 %v2188_v34, %v2851_v59  ;;  %v2854_v51 = vld [vmem:[#allocation44_spill] sm:$0xff] }
 0x36a   : > { %1082 = vst [vmem:[%s2309_s24 + $0x38] sm:$0xff] %v1050_v62  ;;  %v1051_v58 = vadd.f32 %v1019_v42, %v760_v17  ;;  %v1020_v30 = vmul.f32 %v2282_v3, %v986_v50  ;;  %v987_v40 = vsub.f32 %v955_v13, %v2847_v57  ;;  %v956_v12 = vmul.f32 2.0, %v882_v49 }
 0x36b   : > { %v886_v55 = vpop.f32.mrf.mxu0  ;;  %v763_v23 = vadd.f32 %v731_v54, %v472_v1  ;;  %v733_v37 = vmul.f32 %v2242_v29, %v2088_v35  ;;  %v474_v18 = vadd.f32 %v442_v9, %v2277_v60  ;;  %v444_v2 = vmul.f32 %v2188_v34, %v2852_v53 }
 0x36c   : > { %1083 = vst [vmem:[%s2309_s24 + $0x40] sm:$0xff] %v1051_v58  ;;  %v1052_v38 = vadd.f32 %v1020_v30, %v761_v28  ;;  %v1021_v11 = vmul.f32 %v2282_v3, %v987_v40  ;;  %v988_v0 = vsub.f32 %v956_v12, %v2848_v14  ;;  %v957_v63 = vmul.f32 2.0, %v886_v55  ;;  %v2855_v12 = vld [vmem:[#allocation46_spill] sm:$0xff] }
 0x36d   : > { %v888_v56 = vpop.f32.mrf.mxu0  ;;  %v764_v48 = vadd.f32 %v732_v25, %v473_v44  ;;  %v734_v6 = vmul.f32 %v2242_v29, %v2083_v43  ;;  %v445_v17 = vmul.f32 %v2188_v34, %v2853_v4  ;;  %v475_v60 = vadd.f32 %v443_v10, %v2285_v33 }
 0x36e   : > { %1084 = vst [vmem:[%s2309_s24 + $0x48] sm:$0xff] %v1052_v38  ;;  %v1053_v46 = vadd.f32 %v1021_v11, %v762_v27  ;;  %v1022_v57 = vmul.f32 %v2282_v3, %v988_v0  ;;  %v989_v5 = vsub.f32 %v957_v63, %v2849_v22  ;;  %v958_v15 = vmul.f32 2.0, %v888_v56  ;;  %v2856_v11 = vld [vmem:[#allocation48_spill] sm:$0xff]  ;;  %v2857_v56 = vld [vmem:[#allocation50_spill] sm:$0xff] }
 0x36f   : > { %v892_v16 = vpop.f32.mrf.mxu0  ;;  %v765_v32 = vadd.f32 %v733_v37, %v474_v18  ;;  %v735_v45 = vmul.f32 %v2242_v29, %v2078_v41  ;;  %v446_v22 = vmul.f32 %v2188_v34, %v2854_v51  ;;  %v476_v7 = vadd.f32 %v444_v2, %v2291_v39 }
 0x370   : > { %1085 = vst [vmem:[%s2309_s24 + $0x50] sm:$0xff] %v1053_v46  ;;  %v1054_v35 = vadd.f32 %v1022_v57, %v763_v23  ;;  %v1023_v26 = vmul.f32 %v2282_v3, %v989_v5  ;;  %v990_v8 = vsub.f32 %v958_v15, %v2850_v47  ;;  %v959_v14 = vmul.f32 2.0, %v892_v16  ;;  %v2859_v16 = vld [vmem:[#allocation85_spill] sm:$0xff] }
 0x371   : > { %v894_v62 = vpop.f32.mrf.mxu0  ;;  %v766_v28 = vadd.f32 %v734_v6, %v475_v60  ;;  %v736_v33 = vmul.f32 %v2242_v29, %v2073_v19  ;;  %v477_v40 = vadd.f32 %v445_v17, %v2186_v31  ;;  %v447_v1 = vmul.f32 %v2188_v34, %v2855_v12  ;;  %v2860_v17 = vld [vmem:[#allocation14_spill] sm:$0xff] }
 0x372   : > { %1086 = vst [vmem:[%s2309_s24 + $0x58] sm:$0xff] %v1054_v35  ;;  %v1055_v43 = vadd.f32 %v1023_v26, %v764_v48  ;;  %v1024_v42 = vmul.f32 %v2282_v3, %v990_v8  ;;  %v991_v50 = vsub.f32 %v959_v14, %v2851_v59  ;;  %v960_v13 = vmul.f32 2.0, %v894_v62  ;;  %v2858_v48 = vld [vmem:[#allocation52_spill] sm:$0xff] }
 0x373   : > { %v898_v54 = vpop.f32.mrf.mxu0  ;;  %v767_v47 = vadd.f32 %v735_v45, %v476_v7  ;;  %v737_v39 = vmul.f32 %v2242_v29, %v2068_v20  ;;  %v478_v38 = vadd.f32 %v446_v22, %v2191_v52  ;;  %v448_v31 = vmul.f32 %v2188_v34, %v2856_v11  ;;  %v2862_v62 = vld [vmem:[#allocation84_spill] sm:$0xff]  ;;  %v2863_v7 = vld [vmem:[#allocation15_spill] sm:$0xff] }
 0x374   : > { %1087 = vst [vmem:[%s2309_s24 + $0x60] sm:$0xff] %v1055_v43  ;;  %v1056_v41 = vadd.f32 %v1024_v42, %v765_v32  ;;  %v1025_v49 = vmul.f32 %v2282_v3, %v991_v50  ;;  %v992_v58 = vsub.f32 %v960_v13, %v2852_v53  ;;  %v961_v30 = vmul.f32 2.0, %v898_v54  ;;  %v2861_v32 = vld [vmem:[#allocation54_spill] sm:$0xff] }
 0x375   : > { %v900_v9 = vpop.f32.mrf.mxu0  ;;  %v768_v0 = vadd.f32 %v736_v33, %v477_v40  ;;  %v738_v63 = vmul.f32 %v2242_v29, %v2064_v21  ;;  %v479_v37 = vadd.f32 %v447_v1, %v2194_v36  ;;  %v449_v52 = vmul.f32 %v2188_v34, %v2857_v56  ;;  %v2864_v33 = vld [vmem:[#allocation56_spill] sm:$0xff] }
 0x376   : > { %1088 = vst [vmem:[%s2309_s24 + $0x68] sm:$0xff] %v1056_v41  ;;  %v1057_v19 = vadd.f32 %v1025_v49, %v766_v28  ;;  %v1026_v27 = vmul.f32 %v2282_v3, %v992_v58  ;;  %v993_v25 = vsub.f32 %v961_v30, %v2853_v4  ;;  %v962_v55 = vmul.f32 2.0, %v900_v9  ;;  %v2865_v49 = vld [vmem:[#allocation83_spill] sm:$0xff] }
 0x377   : > { %v904_v44 = vpop.f32.mrf.mxu0  ;;  %v769_v46 = vadd.f32 %v737_v39, %v478_v38  ;;  %v739_v57 = vmul.f32 %v2242_v29, %v2060_v24  ;;  %v480_v2 = vadd.f32 %v448_v31, %v2197_v61  ;;  %v450_v36 = vmul.f32 %v2188_v34, %v2858_v48  ;;  %v2866_v39 = vld [vmem:[#allocation16_spill] sm:$0xff] }
 0x378   : > { %1089 = vst [vmem:[%s2309_s24 + $0x70] sm:$0xff] %v1057_v19  ;;  %v1058_v20 = vadd.f32 %v1026_v27, %v767_v47  ;;  %v1027_v59 = vmul.f32 %v2282_v3, %v993_v25  ;;  %v994_v10 = vsub.f32 %v962_v55, %v2854_v51  ;;  %v963_v23 = vmul.f32 2.0, %v904_v44  ;;  %v2867_v19 = vld [vmem:[#allocation58_spill] sm:$0xff] }
 0x379   : > { %v906_v5 = vpop.f32.mrf.mxu0  ;;  %v770_v6 = vadd.f32 %v738_v63, %v479_v37  ;;  %v740_v35 = vmul.f32 %v2242_v29, %v2859_v16  ;;  %v481_v60 = vadd.f32 %v449_v52, %v2860_v17  ;;  %v451_v61 = vmul.f32 %v2188_v34, %v2861_v32  ;;  %v2868_v55 = vld [vmem:[#allocation82_spill] sm:$0xff] }
 0x37a   : > { %1090 = vst [vmem:[%s2309_s24 + $0x78] sm:$0xff] %v1058_v20  ;;  %v1059_v21 = vadd.f32 %v1027_v59, %v768_v0  ;;  %v1028_v15 = vmul.f32 %v2282_v3, %v994_v10  ;;  %v995_v18 = vsub.f32 %v963_v23, %v2855_v12  ;;  %v964_v53 = vmul.f32 2.0, %v906_v5  ;;  %v2869_v20 = vld [vmem:[#allocation17_spill] sm:$0xff]  ;;  %v2870_v10 = vld [vmem:[#allocation59_spill] sm:$0xff] }
 0x37b   : > { %v910_v26 = vpop.f32.mrf.mxu0  ;;  %v771_v45 = vadd.f32 %v739_v57, %v480_v2  ;;  %v741_v43 = vmul.f32 %v2242_v29, %v2862_v62  ;;  %v482_v28 = vadd.f32 %v450_v36, %v2863_v7  ;;  %v452_v54 = vmul.f32 %v2188_v34, %v2864_v33  ;;  %v2873_v2 = vld [vmem:[#allocation61_spill] sm:$0xff] }
 0x37c   : > { %1091 = vst [vmem:[%s2309_s24 + $0x80] sm:$0xff] %v1059_v21  ;;  %v1060_v24 = vadd.f32 %v1028_v15, %v769_v46  ;;  %v1029_v8 = vmul.f32 %v2282_v3, %v995_v18  ;;  %v996_v14 = vsub.f32 %v964_v53, %v2856_v11  ;;  %v965_v4 = vmul.f32 2.0, %v910_v26  ;;  %v2872_v18 = vld [vmem:[#allocation18_spill] sm:$0xff] }
 0x37d   : > { %v912_v42 = vpop.f32.mrf.mxu0  ;;  %v772_v41 = vadd.f32 %v740_v35, %v481_v60  ;;  %v742_v58 = vmul.f32 %v2242_v29, %v2865_v49  ;;  %v483_v9 = vadd.f32 %v451_v61, %v2866_v39  ;;  %v453_v27 = vmul.f32 %v2188_v34, %v2867_v19  ;;  %v2876_v60 = vld [vmem:[#allocation62_spill] sm:$0xff] }
 0x37e   : > { %1092 = vst [vmem:[%s2309_s24 + $0x88] sm:$0xff] %v1060_v24  ;;  %v1061_v50 = vadd.f32 %v1029_v8, %v770_v6  ;;  %v1030_v13 = vmul.f32 %v2282_v3, %v996_v14  ;;  %v997_v51 = vsub.f32 %v965_v4, %v2857_v56  ;;  %v966_v22 = vmul.f32 2.0, %v912_v42  ;;  %v2871_v56 = vld [vmem:[#allocation81_spill] sm:$0xff]  ;;  %v2874_v6 = vld [vmem:[#allocation80_spill] sm:$0xff]  ;;  %v2875_v4 = vld [vmem:[#allocation19_spill] sm:$0xff] }
 0x37f   : > { %v916_v30 = vpop.f32.mrf.mxu0  ;;  %v773_v25 = vadd.f32 %v741_v43, %v482_v28  ;;  %v743_v38 = vmul.f32 %v2242_v29, %v2868_v55  ;;  %v484_v59 = vadd.f32 %v452_v54, %v2869_v20  ;;  %v454_v23 = vmul.f32 %v2188_v34, %v2870_v10  ;;  %v2879_v28 = vld [vmem:[#allocation64_spill] sm:$0xff] }
 0x380   : > { %1093 = vst [vmem:[%s2309_s24 + $0x90] sm:$0xff] %v1061_v50  ;;  %v1062_v40 = vadd.f32 %v1030_v13, %v771_v45  ;;  %v1031_v12 = vmul.f32 %v2282_v3, %v997_v51  ;;  %v998_v1 = vsub.f32 %v966_v22, %v2858_v48  ;;  %v967_v47 = vmul.f32 2.0, %v916_v30  ;;  %v2877_v45 = vld [vmem:[#allocation79_spill] sm:$0xff]  ;;  %v2878_v22 = vld [vmem:[#allocation20_spill] sm:$0xff] }
 0x381   : > { %v918_v11 = vpop.f32.mrf.mxu0  ;;  %v774_v37 = vadd.f32 %v742_v58, %v483_v9  ;;  %v744_v52 = vmul.f32 %v2242_v29, %v2871_v56  ;;  %v485_v53 = vadd.f32 %v453_v27, %v2872_v18  ;;  %v455_v48 = vmul.f32 %v2188_v34, %v2873_v2  ;;  %v2882_v9 = vld [vmem:[#allocation65_spill] sm:$0xff] }
 0x382   : > { %1094 = vst [vmem:[%s2309_s24 + $0x98] sm:$0xff] %v1062_v40  ;;  %v1063_v31 = vadd.f32 %v1031_v12, %v772_v41  ;;  %v1032_v0 = vmul.f32 %v2282_v3, %v998_v1  ;;  %v999_v63 = vsub.f32 %v967_v47, %v2861_v32  ;;  %v968_v44 = vmul.f32 2.0, %v918_v11  ;;  %v2880_v41 = vld [vmem:[#allocation78_spill] sm:$0xff]  ;;  %v2881_v47 = vld [vmem:[#allocation21_spill] sm:$0xff] }
 0x383   : > { %v922_v46 = vpop.f32.mrf.mxu0  ;;  %v775_v36 = vadd.f32 %v743_v38, %v484_v59  ;;  %v745_v16 = vmul.f32 %v2242_v29, %v2874_v6  ;;  %v486_v17 = vadd.f32 %v454_v23, %v2875_v4  ;;  %v456_v32 = vmul.f32 %v2188_v34, %v2876_v60  ;;  %v2885_v59 = vld [vmem:[#allocation67_spill] sm:$0xff] }
 0x384   : > { %1095 = vst [vmem:[%s2309_s24 + $0xa0] sm:$0xff] %v1063_v31  ;;  %v1064_v57 = vadd.f32 %v1032_v0, %v773_v25  ;;  %v1033_v5 = vmul.f32 %v2282_v3, %v999_v63  ;;  %v1000_v21 = vsub.f32 %v968_v44, %v2864_v33  ;;  %v969_v15 = vmul.f32 2.0, %v922_v46  ;;  %v2883_v25 = vld [vmem:[#allocation77_spill] sm:$0xff]  ;;  %v2884_v44 = vld [vmem:[#allocation22_spill] sm:$0xff] }
 0x385   : > { %v924_v35 = vpop.f32.mrf.mxu0  ;;  %v776_v61 = vadd.f32 %v744_v52, %v485_v53  ;;  %v746_v62 = vmul.f32 %v2242_v29, %v2877_v45  ;;  %v487_v7 = vadd.f32 %v455_v48, %v2878_v22  ;;  %v457_v33 = vmul.f32 %v2188_v34, %v2879_v28  ;;  %v2888_v53 = vld [vmem:[#allocation68_spill] sm:$0xff] }
 0x386   : > { %1096 = vst [vmem:[%s2309_s24 + $0xa8] sm:$0xff] %v1064_v57  ;;  %v1065_v26 = vadd.f32 %v1033_v5, %v774_v37  ;;  %v1034_v24 = vmul.f32 %v2282_v3, %v1000_v21  ;;  %v1001_v8 = vsub.f32 %v969_v15, %v2867_v19  ;;  %v970_v14 = vmul.f32 2.0, %v924_v35  ;;  %v2886_v37 = vld [vmem:[#allocation76_spill] sm:$0xff]  ;;  %v2887_v15 = vld [vmem:[#allocation23_spill] sm:$0xff] }
 0x387   : > { %v928_v43 = vpop.f32.mrf.mxu0  ;;  %v777_v54 = vadd.f32 %v745_v16, %v486_v17  ;;  %v747_v49 = vmul.f32 %v2242_v29, %v2880_v41  ;;  %v488_v39 = vadd.f32 %v456_v32, %v2881_v47  ;;  %v458_v19 = vmul.f32 %v2188_v34, %v2882_v9 }
 0x388   : > { %1097 = vst [vmem:[%s2309_s24 + $0xb0] sm:$0xff] %v1065_v26  ;;  %v1066_v42 = vadd.f32 %v1034_v24, %v775_v36  ;;  %v1035_v50 = vmul.f32 %v2282_v3, %v1001_v8  ;;  %v1002_v13 = vsub.f32 %v970_v14, %v2870_v10  ;;  %v971_v51 = vmul.f32 2.0, %v928_v43  ;;  %v2889_v36 = vld [vmem:[#allocation75_spill] sm:$0xff]  ;;  %v2890_v14 = vld [vmem:[#allocation24_spill] sm:$0xff] }
 0x389   : > { %v930_v58 = vpop.f32.mrf.mxu0  ;;  %v778_v27 = vadd.f32 %v746_v62, %v487_v7  ;;  %v748_v55 = vmul.f32 %v2242_v29, %v2883_v25  ;;  %v489_v20 = vadd.f32 %v457_v33, %v2884_v44  ;;  %v459_v10 = vmul.f32 %v2188_v34, %v2885_v59 }
 0x38a   : > { %1098 = vst [vmem:[%s2309_s24 + $0xb8] sm:$0xff] %v1066_v42  ;;  %v1067_v30 = vadd.f32 %v1035_v50, %v776_v61  ;;  %v1036_v40 = vmul.f32 %v2282_v3, %v1002_v13  ;;  %v1003_v12 = vsub.f32 %v971_v51, %v2873_v2  ;;  %v972_v1 = vmul.f32 2.0, %v930_v58  ;;  %v2892_v42 = vld [vmem:[#allocation25_spill] sm:$0xff] }
 0x38b   : > { %v934_v38 = vpop.f32.mrf.mxu0  ;;  %v779_v23 = vadd.f32 %v747_v49, %v488_v39  ;;  %v749_v56 = vmul.f32 %v2242_v29, %v2886_v37  ;;  %v490_v18 = vadd.f32 %v458_v19, %v2887_v15  ;;  %v460_v2 = vmul.f32 %v2188_v34, %v2888_v53 }
 0x38c   : > { %1099 = vst [vmem:[%s2309_s24 + $0xc0] sm:$0xff] %v1067_v30  ;;  %v1068_v11 = vadd.f32 %v1036_v40, %v777_v54  ;;  %v1037_v31 = vmul.f32 %v2282_v3, %v1003_v12  ;;  %v1004_v0 = vsub.f32 %v972_v1, %v2876_v60  ;;  %v973_v63 = vmul.f32 2.0, %v934_v38  ;;  %v2891_v60 = vld [vmem:[#allocation74_spill] sm:$0xff] }
 0x38d   : > { %v936_v52 = vpop.f32.mrf.mxu0  ;;  %v780_v48 = vadd.f32 %v748_v55, %v489_v20  ;;  %v750_v6 = vmul.f32 %v2242_v29, %v2889_v36  ;;  %v491_v4 = vadd.f32 %v459_v10, %v2890_v14  ;;  %v781_v17 = vadd.f32 %v749_v56, %v490_v18 }
 0x38e   : > { %1100 = vst [vmem:[%s2309_s24 + $0xc8] sm:$0xff] %v1068_v11  ;;  %v1069_v46 = vadd.f32 %v1037_v31, %v778_v27  ;;  %v1038_v57 = vmul.f32 %v2282_v3, %v1004_v0  ;;  %v1005_v5 = vsub.f32 %v973_v63, %v2879_v28  ;;  %v974_v21 = vmul.f32 2.0, %v936_v52 }
 0x38f   : > { %v940_v16 = vpop.f32.mrf.mxu0  ;;  %v751_v34 = vmul.f32 %v2242_v29, %v2891_v60  ;;  %v492_v50 = vadd.f32 %v460_v2, %v2892_v42  ;;  %v782_v13 = vadd.f32 %v750_v6, %v491_v4 }
 0x390   : > { %1101 = vst [vmem:[%s2309_s24 + $0xd0] sm:$0xff] %v1069_v46  ;;  %v1070_v35 = vadd.f32 %v1038_v57, %v779_v23  ;;  %v1039_v26 = vmul.f32 %v2282_v3, %v1005_v5  ;;  %v1006_v24 = vsub.f32 %v974_v21, %v2882_v9  ;;  %v975_v8 = vmul.f32 2.0, %v940_v16 }
 0x391   : > { %v942_v32 = vpop.f32.mrf.mxu0  ;;  %v783_v7 = vadd.f32 %v751_v34, %v492_v50 }
 0x392   : > { %1102 = vst [vmem:[%s2309_s24 + $0xd8] sm:$0xff] %v1070_v35  ;;  %v1071_v61 = vadd.f32 %v1039_v26, %v780_v48  ;;  %v1040_v45 = vmul.f32 %v2282_v3, %v1006_v24  ;;  %v1007_v62 = vsub.f32 %v975_v8, %v2885_v59  ;;  %v976_v43 = vmul.f32 2.0, %v942_v32 }
 0x394   : > { %1103 = vst [vmem:[%s2309_s24 + $0xe0] sm:$0xff] %v1071_v61  ;;  %v1072_v51 = vadd.f32 %v1040_v45, %v781_v17  ;;  %v1041_v29 = vmul.f32 %v2282_v3, %v1007_v62  ;;  %v1008_v22 = vsub.f32 %v976_v43, %v2888_v53 }
 0x396   : > { %1104 = vst [vmem:[%s2309_s24 + $0xe8] sm:$0xff] %v1072_v51  ;;  %v1073_v28 = vadd.f32 %v1041_v29, %v782_v13  ;;  %v1042_v33 = vmul.f32 %v2282_v3, %v1008_v22 }
 0x398   : > { %1105 = vst [vmem:[%s2309_s24 + $0xf0] sm:$0xff] %v1073_v28  ;;  %v1074_v54 = vadd.f32 %v1042_v33, %v783_v7 }
 0x39a   : > { %1106 = vst [vmem:[%s2309_s24 + $0xf8] sm:$0xff] %v1074_v54 }
 0x39b   : > { %1401 = shalt.err (!%p1398_p10)
}
 0x39c   : > { %s1402_s22 = scalar_lea.hbm %s2538_s10, 4096  ;;  %s1406_s11 = scalar_lea.hbm %s2588_s3, 8192 }
 0x39d   : > { %p1403_p5 = scmp.ne.s32.totalorder %s2538_s10, %s1402_s22  ;;  %p1407_p12 = scmp.lt.s32.totalorder %s2538_s10, %s2588_s3 }
 0x39e   : > { %p1408_p13 = scmp.lt.s32.totalorder %s1406_s11, %s1402_s22 }
 0x39f   : > { %p1404_p11 = pnand %p1403_p5, %p2893_p1 }
 0x3a0   : > { %p1409_p4 = por %p1408_p13, %p1407_p12 }
 0x3a1   : > { %p1405_p6 = pneg %p1404_p11 }
 0x3a3   : > { %p1410_p0 = pnand %p1409_p4, %p1405_p6 }
 0x3a5   : > { %1413 = shalt.err (!%p1410_p0)
}
 0x3a6   : > { %s1470_s21 = smov 256   ;;  %s1471_s29 = smov 512  }
 0x3a7   : > { %s1472_s24 = smov 16  }
 0x3a8   : > { %1265 = dma.vmem_to_hbm [thread:$0]  (%p2893_p1), %s2540_s8, 4096, %s2538_s10, %s1108_s0, %s1470_s21, %s1471_s29, %s1472_s24  }
 0x3a9 PF: > { %s1136_s7 = sand.u32 1, %s1446_s15   ;;  %p2894_p2 = scmp.ne.s32.totalorder %s2716_s27, 0 }
 0x3aa   : > { %p2895_p3 = scmp.ge.s32.totalorder %s1458_s18, 2  ;;  %s1137_s9 = scalar_lea.sflag [#allocation6], %s1136_s7 }
 0x3ac   : > { %p1276_p7 = pnand %p2895_p3, %p2894_p2 }
 0x3ae   : > { %p1277_p8 = pneg %p1276_p7 }
 0x3b0   : > { %1441 = dma.done.wait (%p1277_p8), %s1137_s9, 4096  }
 0x3b1   : > { %1443 = vsyncadd (%p1277_p8), %s1137_s9, 4294963200  ;;  %p21_p9 = scmp.ge.s32.totalorder %s1521_s20, 4   ;;  %s2896_s15 = smov %s1450_s16 }
 0x3b2   : > { %s2897_s16 = smov %s1454_s17  ;;  %s2898_s17 = smov %s1533_s23 }
 0x3b3   : > { %s2899_s18 = smov %s1521_s20  ;;  %23 = sbr.rel (!%p21_p9) target bundleno = 11 (0xb), region = 78 }
 0x3b8   :  { %1142 = vsyncpa [#allocation5], 1 }
 0x3b9   :  { %1144 = vsyncpa [#allocation5 + $0x1], 1 }
 0x3ba   :  { %1145 = vsyncpa [#allocation8], 1 }
 0x3bb   :  { %1147 = vsyncpa [#allocation8 + $0x1], 1 }
 0x3bc   :  { %1148 = vsyncpa [#allocation6], 1 }
 0x3bd   :  { %1150 = vsyncpa [#allocation6 + $0x1], 1 }

</bundles_post_ra>
